<compile_context>
chip_gen: v7x
topology: tpu7x:2x2x1
jax: 0.10.0
libtpu: 0.0.40
codegen_flags: <defaults>
</compile_context>

<pallas_src>
import jax
import jax.numpy as jnp
from jax.experimental import pallas as pl
from jax.experimental.pallas import tpu as pltpu

# ---- small, module-consistent shapes -------------------------------------
BATCH      = 2
SEQ_LEN    = 8
INPUT_DIM  = 32
NUM_HEADS  = 4
HEAD_DIM   = INPUT_DIM // NUM_HEADS
HIDDEN_DIM = 64
NUM_LAYERS = 2
LN_EPS     = 1e-5
N_TOKENS   = BATCH * SEQ_LEN


# ---------------------------------------------------------------------------
# Kernel: single invocation, all layers fused, all tokens (B*S rows) at once.
# ---------------------------------------------------------------------------
def encoder_kernel(x_ref,
                   wqkv_ref,   # (L, D, 3D)   columns = [Wq | Wk | Wv]
                   bqkv_ref,   # (L, 1, 3D)
                   wo_ref,     # (L, D, D)
                   w1_ref,     # (L, D, HIDDEN)
                   b1_ref,     # (L, 1, HIDDEN)
                   w2_ref,     # (L, HIDDEN, D)
                   vec_ref,    # (L, 6, D) rows: bo, b2, g1, be1, g2, be2
                   out_ref):
    f32 = jnp.float32
    D, dh, H, S, B = INPUT_DIM, HEAD_DIM, NUM_HEADS, SEQ_LEN, BATCH

    x = x_ref[...].astype(f32)                      # (B*S, D) = (16, 32)
    scale = float(dh) ** -0.5

    # Constant per-head lane masks (hoisted out of the layer loop).
    lane = jax.lax.broadcasted_iota(jnp.int32, (1, D), 1)
    head_masks = [((lane >= h * dh) & (lane < (h + 1) * dh)).astype(f32)
                  for h in range(H)]

    for l in range(NUM_LAYERS):                     # static unroll
        wqkv = wqkv_ref[l]                          # (D, 3D)
        bqkv = bqkv_ref[l]                          # (1, 3D)
        wo   = wo_ref[l]                            # (D, D)
        w1   = w1_ref[l]                            # (D, HID)
        b1   = b1_ref[l]                            # (1, HID)
        w2   = w2_ref[l]                            # (HID, D)
        vec  = vec_ref[l]                           # (6, D)
        bo, b2   = vec[0:1, :], vec[1:2, :]
        g1, be1  = vec[2:3, :], vec[3:4, :]
        g2, be2  = vec[4:5, :], vec[5:6, :]

        # --- fused QKV projection: one MXU pass over all B*S tokens ---------
        qkv = jnp.dot(x, wqkv, preferred_element_type=f32) + bqkv   # (B*S, 3D)
        q = qkv[:, 0:D]
        k = qkv[:, D:2 * D]
        v = qkv[:, 2 * D:3 * D]

        # --- multi-head self-attention (unmasked, matching the reference) ---
        # Per-batch row blocks are sublane slices (free); per-head structure is
        # handled with constant lane masks -> no lane shifts on the dep chain.
        o_blocks = []
        for b in range(B):
            rows = slice(b * S, (b + 1) * S)
            qb, kb, vb = q[rows, :], k[rows, :], v[rows, :]         # (S, D)
            ob = jnp.zeros((S, D), f32)
            for h in range(H):
                m = head_masks[h]                                   # (1, D)
                # (q_b * m) @ k_b^T == q_bh @ k_bh^T exactly (masked lanes = 0)
                e = jax.lax.dot_general(
                    qb * m, kb, (((1,), (1,)), ((), ())),
                    preferred_element_type=f32) * scale             # (S, S)
                e = e - jnp.max(e, axis=-1, keepdims=True)
                p = jnp.exp(e)
                p = p / jnp.sum(p, axis=-1, keepdims=True)          # exact softmax
                # p @ v_b gives correct columns for head h; keep only those.
                ob = ob + m * jnp.dot(p, vb, preferred_element_type=f32)
            o_blocks.append(ob)
        o = jnp.concatenate(o_blocks, axis=0)                       # (B*S, D)

        # output projection (head merge already in h-major lane layout)
        att = jnp.dot(o, wo, preferred_element_type=f32) + bo       # (B*S, D)

        # --- x = x + LayerNorm1(attended)   (dropout == identity) -----------
        mu1  = jnp.mean(att, axis=-1, keepdims=True)
        var1 = jnp.mean((att - mu1) ** 2, axis=-1, keepdims=True)
        ln1  = (att - mu1) * jax.lax.rsqrt(var1 + LN_EPS) * g1 + be1
        x1 = x + ln1

        # --- feed-forward: Linear -> ReLU -> Linear --------------------------
        hdn = jnp.maximum(jnp.dot(x1, w1, preferred_element_type=f32) + b1, 0.0)
        ff  = jnp.dot(hdn, w2, preferred_element_type=f32) + b2

        # --- x = x + LayerNorm2(fed_forward) ---------------------------------
        mu2  = jnp.mean(ff, axis=-1, keepdims=True)
        var2 = jnp.mean((ff - mu2) ** 2, axis=-1, keepdims=True)
        ln2  = (ff - mu2) * jax.lax.rsqrt(var2 + LN_EPS) * g2 + be2
        x = x1 + ln2

    out_ref[...] = x.astype(out_ref.dtype)


# ---------------------------------------------------------------------------
# Wrapper: single pallas_call, single grid step, everything resident in VMEM.
# ---------------------------------------------------------------------------
def _full_spec(shape):
    nd = len(shape)
    return pl.BlockSpec(shape, lambda i, nd=nd: (0,) * nd)


@jax.jit
def transformer_encoder(x, wqkv, bqkv, wo, w1, b1, w2, vec):
    B, S, D = x.shape
    xf = x.reshape(B * S, D)                 # fold batch into rows (free in XLA)
    weight_args = (wqkv, bqkv, wo, w1, b1, w2, vec)

    out = pl.pallas_call(
        encoder_kernel,
        out_shape=jax.ShapeDtypeStruct((B * S, D), jnp.float32),
        grid=(1,),
        in_specs=[_full_spec(xf.shape)] + [_full_spec(a.shape) for a in weight_args],
        out_specs=_full_spec((B * S, D)),
        compiler_params=pltpu.CompilerParams(
            dimension_semantics=("arbitrary",),
        ),
    )(xf, *weight_args)
    return out.reshape(B, S, D)


# ---------------------------------------------------------------------------
# Parameter construction / packing
# ---------------------------------------------------------------------------
def init_layer_params(key):
    """Deterministic synthetic parameters for one encoder layer.

    Linear weights are stored (in, out) so the math is x @ W + b.
    """
    ks = jax.random.split(key, 8)
    D, Hd = INPUT_DIM, HIDDEN_DIM
    s_d = 1.0 / jnp.sqrt(jnp.float32(D))
    s_h = 1.0 / jnp.sqrt(jnp.float32(Hd))
    wq = jax.random.uniform(ks[0], (D, D),  jnp.float32, -s_d, s_d)
    wk = jax.random.uniform(ks[1], (D, D),  jnp.float32, -s_d, s_d)
    wv = jax.random.uniform(ks[2], (D, D),  jnp.float32, -s_d, s_d)
    wo = jax.random.uniform(ks[3], (D, D),  jnp.float32, -s_d, s_d)
    bq = jax.random.uniform(ks[4], (1, D),  jnp.float32, -s_d, s_d)
    bk = jax.random.uniform(ks[5], (1, D),  jnp.float32, -s_d, s_d)
    bv = jax.random.uniform(ks[6], (1, D),  jnp.float32, -s_d, s_d)
    bo = jnp.zeros((1, D), jnp.float32)
    w1 = jax.random.uniform(ks[7], (D, Hd), jnp.float32, -s_d, s_d)
    b1 = jnp.zeros((1, Hd), jnp.float32)
    w2 = jax.random.uniform(jax.random.fold_in(key, 99), (Hd, D),
                            jnp.float32, -s_h, s_h)
    b2 = jnp.zeros((1, D), jnp.float32)
    g1, be1 = jnp.ones((1, D), jnp.float32), jnp.zeros((1, D), jnp.float32)
    g2, be2 = jnp.ones((1, D), jnp.float32), jnp.zeros((1, D), jnp.float32)
    return (wq, bq, wk, bk, wv, bv, wo, bo,
            g1, be1, w1, b1, w2, b2, g2, be2)


def pack_params(all_params):
    """Host-side packing into per-layer slabs (free layout plumbing)."""
    wqkv_l, bqkv_l, wo_l, w1_l, b1_l, w2_l, vec_l = ([] for _ in range(7))
    for (wq, bq, wk, bk, wv, bv, wo, bo,
         g1, be1, w1, b1, w2, b2, g2, be2) in all_params:
        wqkv_l.append(jnp.concatenate([wq, wk, wv], axis=1))   # (D, 3D)
        bqkv_l.append(jnp.concatenate([bq, bk, bv], axis=1))   # (1, 3D)
        wo_l.append(wo)                                        # (D, D)
        w1_l.append(w1)
        b1_l.append(b1)
        w2_l.append(w2)
        vec_l.append(jnp.concatenate([bo, b2, g1, be1, g2, be2], axis=0))  # (6, D)
    return (jnp.stack(wqkv_l), jnp.stack(bqkv_l), jnp.stack(wo_l),
            jnp.stack(w1_l), jnp.stack(b1_l), jnp.stack(w2_l), jnp.stack(vec_l))


# ---------------- pure-JAX reference for a sanity check --------------------
def _ref_layer(x, p):
    (wq, bq, wk, bk, wv, bv, wo, bo, g1, be1, w1, b1, w2, b2, g2, be2) = p
    B, S, D = x.shape
    q = x @ wq + bq
    k = x @ wk + bk
    v = x @ wv + bv
    def split(t):
        return t.reshape(B, S, NUM_HEADS, HEAD_DIM).transpose(0, 2, 1, 3)
    Q, K, V = split(q), split(k), split(v)
    e = jnp.einsum('bhsd,bhtd->bhst', Q, K) / jnp.sqrt(jnp.float32(HEAD_DIM))
    a = jax.nn.softmax(e, axis=-1)
    o = jnp.einsum('bhst,bhtd->bhsd', a, V)
    o = o.transpose(0, 2, 1, 3).reshape(B, S, D) @ wo + bo
    def ln(t, g, b):
        m = t.mean(-1, keepdims=True)
        var = ((t - m) ** 2).mean(-1, keepdims=True)
        return (t - m) * jax.lax.rsqrt(var + LN_EPS) * g + b
    x1 = x + ln(o, g1, be1)
    ff = jnp.maximum(x1 @ w1 + b1, 0.0) @ w2 + b2
    return x1 + ln(ff, g2, be2)


if __name__ == "__main__":
    root = jax.random.PRNGKey(0)
    kx, kp = jax.random.split(root)
    x = jax.random.normal(kx, (BATCH, SEQ_LEN, INPUT_DIM), jnp.float32)

    layer_keys = jax.random.split(kp, NUM_LAYERS)
    all_params = [init_layer_params(k) for k in layer_keys]
    packed = pack_params(all_params)

    out = transformer_encoder(x, *packed)
    out = jax.block_until_ready(out)

    # reference check
    ref = x
    for p in all_params:
        ref = _ref_layer(ref, p)
    assert out.shape == (BATCH, SEQ_LEN, INPUT_DIM)
    assert jnp.allclose(out, ref, atol=1e-4, rtol=1e-4), "mismatch vs JAX reference"

    print("KERNEL_OK")
</pallas_src>

<mosaic_0001>
module attributes {stable_mosaic.version = 11 : i64} {
  func.func @encoder_kernel(%arg0: i32, %arg1: memref<16x32xf32, #tpu.memory_space<vmem>>, %arg2: memref<2x32x96xf32, #tpu.memory_space<vmem>>, %arg3: memref<2x1x96xf32, #tpu.memory_space<vmem>>, %arg4: memref<2x32x32xf32, #tpu.memory_space<vmem>>, %arg5: memref<2x32x64xf32, #tpu.memory_space<vmem>>, %arg6: memref<2x1x64xf32, #tpu.memory_space<vmem>>, %arg7: memref<2x64x32xf32, #tpu.memory_space<vmem>>, %arg8: memref<2x6x32xf32, #tpu.memory_space<vmem>>, %arg9: memref<16x32xf32, #tpu.memory_space<vmem>>) attributes {dimension_semantics = [#tpu.dimension_semantics<arbitrary>], iteration_bounds = array<i64: 1>, scalar_prefetch = 0 : i64, scratch_operands = 0 : i64, tpu.core_type = #tpu.core_type<tc>, window_params = [{pipeline_mode = #tpu.pipeline_mode<synchronous>, transform_indices = @transform_0, window_bounds = array<i64: 16, 32>}, {pipeline_mode = #tpu.pipeline_mode<synchronous>, transform_indices = @transform_1, window_bounds = array<i64: 2, 32, 96>}, {pipeline_mode = #tpu.pipeline_mode<synchronous>, transform_indices = @transform_2, window_bounds = array<i64: 2, 1, 96>}, {pipeline_mode = #tpu.pipeline_mode<synchronous>, transform_indices = @transform_3, window_bounds = array<i64: 2, 32, 32>}, {pipeline_mode = #tpu.pipeline_mode<synchronous>, transform_indices = @transform_4, window_bounds = array<i64: 2, 32, 64>}, {pipeline_mode = #tpu.pipeline_mode<synchronous>, transform_indices = @transform_5, window_bounds = array<i64: 2, 1, 64>}, {pipeline_mode = #tpu.pipeline_mode<synchronous>, transform_indices = @transform_6, window_bounds = array<i64: 2, 64, 32>}, {pipeline_mode = #tpu.pipeline_mode<synchronous>, transform_indices = @transform_7, window_bounds = array<i64: 2, 6, 32>}, {pipeline_mode = #tpu.pipeline_mode<synchronous>, transform_indices = @transform_8, window_bounds = array<i64: 16, 32>}]} {
    %c0 = arith.constant 0 : index
    %c0_0 = arith.constant 0 : index
    %0 = vector.load %arg1[%c0, %c0_0] : memref<16x32xf32, #tpu.memory_space<vmem>>, vector<16x32xf32>
    %1 = tpu.iota {dimensions = array<i32: 1>} : vector<1x32xi32>
    %c0_i32 = arith.constant 0 : i32
    %2 = vector.broadcast %c0_i32 : i32 to vector<1x32xi32>
    %3 = arith.cmpi sge, %1, %2 : vector<1x32xi32>
    %c8_i32 = arith.constant 8 : i32
    %4 = vector.broadcast %c8_i32 : i32 to vector<1x32xi32>
    %5 = arith.cmpi slt, %1, %4 : vector<1x32xi32>
    %6 = arith.andi %3, %5 : vector<1x32xi1>
    %7 = arith.extui %6 : vector<1x32xi1> to vector<1x32xi32>
    %8 = arith.sitofp %7 : vector<1x32xi32> to vector<1x32xf32>
    %c8_i32_1 = arith.constant 8 : i32
    %9 = vector.broadcast %c8_i32_1 : i32 to vector<1x32xi32>
    %10 = arith.cmpi sge, %1, %9 : vector<1x32xi32>
    %c16_i32 = arith.constant 16 : i32
    %11 = vector.broadcast %c16_i32 : i32 to vector<1x32xi32>
    %12 = arith.cmpi slt, %1, %11 : vector<1x32xi32>
    %13 = arith.andi %10, %12 : vector<1x32xi1>
    %14 = arith.extui %13 : vector<1x32xi1> to vector<1x32xi32>
    %15 = arith.sitofp %14 : vector<1x32xi32> to vector<1x32xf32>
    %c16_i32_2 = arith.constant 16 : i32
    %16 = vector.broadcast %c16_i32_2 : i32 to vector<1x32xi32>
    %17 = arith.cmpi sge, %1, %16 : vector<1x32xi32>
    %c24_i32 = arith.constant 24 : i32
    %18 = vector.broadcast %c24_i32 : i32 to vector<1x32xi32>
    %19 = arith.cmpi slt, %1, %18 : vector<1x32xi32>
    %20 = arith.andi %17, %19 : vector<1x32xi1>
    %21 = arith.extui %20 : vector<1x32xi1> to vector<1x32xi32>
    %22 = arith.sitofp %21 : vector<1x32xi32> to vector<1x32xf32>
    %c24_i32_3 = arith.constant 24 : i32
    %23 = vector.broadcast %c24_i32_3 : i32 to vector<1x32xi32>
    %24 = arith.cmpi sge, %1, %23 : vector<1x32xi32>
    %c32_i32 = arith.constant 32 : i32
    %25 = vector.broadcast %c32_i32 : i32 to vector<1x32xi32>
    %26 = arith.cmpi slt, %1, %25 : vector<1x32xi32>
    %27 = arith.andi %24, %26 : vector<1x32xi1>
    %28 = arith.extui %27 : vector<1x32xi1> to vector<1x32xi32>
    %29 = arith.sitofp %28 : vector<1x32xi32> to vector<1x32xf32>
    %c0_4 = arith.constant 0 : index
    %c0_5 = arith.constant 0 : index
    %c0_6 = arith.constant 0 : index
    %30 = vector.load %arg2[%c0_4, %c0_5, %c0_6] : memref<2x32x96xf32, #tpu.memory_space<vmem>>, vector<1x32x96xf32>
    %31 = vector.shape_cast %30 : vector<1x32x96xf32> to vector<32x96xf32>
    %c0_7 = arith.constant 0 : index
    %c0_8 = arith.constant 0 : index
    %c0_9 = arith.constant 0 : index
    %32 = vector.load %arg3[%c0_7, %c0_8, %c0_9] : memref<2x1x96xf32, #tpu.memory_space<vmem>>, vector<1x1x96xf32>
    %33 = vector.shape_cast %32 : vector<1x1x96xf32> to vector<1x96xf32>
    %c0_10 = arith.constant 0 : index
    %c0_11 = arith.constant 0 : index
    %c0_12 = arith.constant 0 : index
    %34 = vector.load %arg4[%c0_10, %c0_11, %c0_12] : memref<2x32x32xf32, #tpu.memory_space<vmem>>, vector<1x32x32xf32>
    %35 = vector.shape_cast %34 : vector<1x32x32xf32> to vector<32x32xf32>
    %c0_13 = arith.constant 0 : index
    %c0_14 = arith.constant 0 : index
    %c0_15 = arith.constant 0 : index
    %36 = vector.load %arg5[%c0_13, %c0_14, %c0_15] : memref<2x32x64xf32, #tpu.memory_space<vmem>>, vector<1x32x64xf32>
    %37 = vector.shape_cast %36 : vector<1x32x64xf32> to vector<32x64xf32>
    %c0_16 = arith.constant 0 : index
    %c0_17 = arith.constant 0 : index
    %c0_18 = arith.constant 0 : index
    %38 = vector.load %arg6[%c0_16, %c0_17, %c0_18] : memref<2x1x64xf32, #tpu.memory_space<vmem>>, vector<1x1x64xf32>
    %39 = vector.shape_cast %38 : vector<1x1x64xf32> to vector<1x64xf32>
    %c0_19 = arith.constant 0 : index
    %c0_20 = arith.constant 0 : index
    %c0_21 = arith.constant 0 : index
    %40 = vector.load %arg7[%c0_19, %c0_20, %c0_21] : memref<2x64x32xf32, #tpu.memory_space<vmem>>, vector<1x64x32xf32>
    %41 = vector.shape_cast %40 : vector<1x64x32xf32> to vector<64x32xf32>
    %c0_22 = arith.constant 0 : index
    %c0_23 = arith.constant 0 : index
    %c0_24 = arith.constant 0 : index
    %42 = vector.load %arg8[%c0_22, %c0_23, %c0_24] : memref<2x6x32xf32, #tpu.memory_space<vmem>>, vector<1x6x32xf32>
    %43 = vector.shape_cast %42 : vector<1x6x32xf32> to vector<6x32xf32>
    %44 = vector.extract_strided_slice %43 {offsets = [0, 0], sizes = [1, 32], strides = [1, 1]} : vector<6x32xf32> to vector<1x32xf32>
    %45 = vector.extract_strided_slice %43 {offsets = [1, 0], sizes = [1, 32], strides = [1, 1]} : vector<6x32xf32> to vector<1x32xf32>
    %46 = vector.extract_strided_slice %43 {offsets = [2, 0], sizes = [1, 32], strides = [1, 1]} : vector<6x32xf32> to vector<1x32xf32>
    %47 = vector.extract_strided_slice %43 {offsets = [3, 0], sizes = [1, 32], strides = [1, 1]} : vector<6x32xf32> to vector<1x32xf32>
    %48 = vector.extract_strided_slice %43 {offsets = [4, 0], sizes = [1, 32], strides = [1, 1]} : vector<6x32xf32> to vector<1x32xf32>
    %49 = vector.extract_strided_slice %43 {offsets = [5, 0], sizes = [1, 32], strides = [1, 1]} : vector<6x32xf32> to vector<1x32xf32>
    %cst = arith.constant dense<0.000000e+00> : vector<16x96xf32>
    %50 = tpu.matmul %0, %31, %cst {dimension_numbers = #tpu.dot_dimension_numbers<[1], [0], [0], [1], [0, 0, 1, 1], [], []>} : vector<16x32xf32>, vector<32x96xf32>, vector<16x96xf32> -> vector<16x96xf32>
    %51 = vector.broadcast %33 : vector<1x96xf32> to vector<16x96xf32>
    %52 = arith.addf %50, %51 : vector<16x96xf32>
    %53 = vector.extract_strided_slice %52 {offsets = [0, 0], sizes = [16, 32], strides = [1, 1]} : vector<16x96xf32> to vector<16x32xf32>
    %54 = vector.extract_strided_slice %52 {offsets = [0, 32], sizes = [16, 32], strides = [1, 1]} : vector<16x96xf32> to vector<16x32xf32>
    %55 = vector.extract_strided_slice %52 {offsets = [0, 64], sizes = [16, 32], strides = [1, 1]} : vector<16x96xf32> to vector<16x32xf32>
    %56 = vector.extract_strided_slice %53 {offsets = [0, 0], sizes = [8, 32], strides = [1, 1]} : vector<16x32xf32> to vector<8x32xf32>
    %57 = vector.extract_strided_slice %54 {offsets = [0, 0], sizes = [8, 32], strides = [1, 1]} : vector<16x32xf32> to vector<8x32xf32>
    %58 = vector.extract_strided_slice %55 {offsets = [0, 0], sizes = [8, 32], strides = [1, 1]} : vector<16x32xf32> to vector<8x32xf32>
    %cst_25 = arith.constant 0.000000e+00 : f32
    %59 = vector.broadcast %cst_25 : f32 to vector<8x32xf32>
    %60 = vector.broadcast %8 : vector<1x32xf32> to vector<8x32xf32>
    %61 = arith.mulf %56, %60 : vector<8x32xf32>
    %cst_26 = arith.constant dense<0.000000e+00> : vector<8x8xf32>
    %62 = tpu.matmul %61, %57, %cst_26 {dimension_numbers = #tpu.dot_dimension_numbers<[1], [1], [0], [0], [0, 0, 1, 0], [], []>} : vector<8x32xf32>, vector<8x32xf32>, vector<8x8xf32> -> vector<8x8xf32>
    %cst_27 = arith.constant 0.353553385 : f32
    %63 = vector.broadcast %cst_27 : f32 to vector<8x8xf32>
    %64 = arith.mulf %62, %63 : vector<8x8xf32>
    %cst_28 = arith.constant dense<0xFF800000> : vector<8xf32>
    %65 = vector.multi_reduction <maximumf>, %64, %cst_28 [1] : vector<8x8xf32> to vector<8xf32>
    %66 = vector.shape_cast %65 : vector<8xf32> to vector<8x1xf32>
    %67 = vector.broadcast %66 : vector<8x1xf32> to vector<8x8xf32>
    %68 = arith.subf %64, %67 : vector<8x8xf32>
    %69 = math.exp %68 : vector<8x8xf32>
    %cst_29 = arith.constant dense<0.000000e+00> : vector<8xf32>
    %70 = vector.multi_reduction <add>, %69, %cst_29 [1] : vector<8x8xf32> to vector<8xf32>
    %71 = vector.shape_cast %70 : vector<8xf32> to vector<8x1xf32>
    %72 = vector.broadcast %71 : vector<8x1xf32> to vector<8x8xf32>
    %73 = arith.divf %69, %72 : vector<8x8xf32>
    %cst_30 = arith.constant dense<0.000000e+00> : vector<8x32xf32>
    %74 = tpu.matmul %73, %58, %cst_30 {dimension_numbers = #tpu.dot_dimension_numbers<[1], [0], [0], [1], [0, 0, 1, 1], [], []>} : vector<8x8xf32>, vector<8x32xf32>, vector<8x32xf32> -> vector<8x32xf32>
    %75 = vector.broadcast %8 : vector<1x32xf32> to vector<8x32xf32>
    %76 = arith.mulf %75, %74 : vector<8x32xf32>
    %77 = arith.addf %59, %76 : vector<8x32xf32>
    %78 = vector.broadcast %15 : vector<1x32xf32> to vector<8x32xf32>
    %79 = arith.mulf %56, %78 : vector<8x32xf32>
    %cst_31 = arith.constant dense<0.000000e+00> : vector<8x8xf32>
    %80 = tpu.matmul %79, %57, %cst_31 {dimension_numbers = #tpu.dot_dimension_numbers<[1], [1], [0], [0], [0, 0, 1, 0], [], []>} : vector<8x32xf32>, vector<8x32xf32>, vector<8x8xf32> -> vector<8x8xf32>
    %cst_32 = arith.constant 0.353553385 : f32
    %81 = vector.broadcast %cst_32 : f32 to vector<8x8xf32>
    %82 = arith.mulf %80, %81 : vector<8x8xf32>
    %cst_33 = arith.constant dense<0xFF800000> : vector<8xf32>
    %83 = vector.multi_reduction <maximumf>, %82, %cst_33 [1] : vector<8x8xf32> to vector<8xf32>
    %84 = vector.shape_cast %83 : vector<8xf32> to vector<8x1xf32>
    %85 = vector.broadcast %84 : vector<8x1xf32> to vector<8x8xf32>
    %86 = arith.subf %82, %85 : vector<8x8xf32>
    %87 = math.exp %86 : vector<8x8xf32>
    %cst_34 = arith.constant dense<0.000000e+00> : vector<8xf32>
    %88 = vector.multi_reduction <add>, %87, %cst_34 [1] : vector<8x8xf32> to vector<8xf32>
    %89 = vector.shape_cast %88 : vector<8xf32> to vector<8x1xf32>
    %90 = vector.broadcast %89 : vector<8x1xf32> to vector<8x8xf32>
    %91 = arith.divf %87, %90 : vector<8x8xf32>
    %cst_35 = arith.constant dense<0.000000e+00> : vector<8x32xf32>
    %92 = tpu.matmul %91, %58, %cst_35 {dimension_numbers = #tpu.dot_dimension_numbers<[1], [0], [0], [1], [0, 0, 1, 1], [], []>} : vector<8x8xf32>, vector<8x32xf32>, vector<8x32xf32> -> vector<8x32xf32>
    %93 = vector.broadcast %15 : vector<1x32xf32> to vector<8x32xf32>
    %94 = arith.mulf %93, %92 : vector<8x32xf32>
    %95 = arith.addf %77, %94 : vector<8x32xf32>
    %96 = vector.broadcast %22 : vector<1x32xf32> to vector<8x32xf32>
    %97 = arith.mulf %56, %96 : vector<8x32xf32>
    %cst_36 = arith.constant dense<0.000000e+00> : vector<8x8xf32>
    %98 = tpu.matmul %97, %57, %cst_36 {dimension_numbers = #tpu.dot_dimension_numbers<[1], [1], [0], [0], [0, 0, 1, 0], [], []>} : vector<8x32xf32>, vector<8x32xf32>, vector<8x8xf32> -> vector<8x8xf32>
    %cst_37 = arith.constant 0.353553385 : f32
    %99 = vector.broadcast %cst_37 : f32 to vector<8x8xf32>
    %100 = arith.mulf %98, %99 : vector<8x8xf32>
    %cst_38 = arith.constant dense<0xFF800000> : vector<8xf32>
    %101 = vector.multi_reduction <maximumf>, %100, %cst_38 [1] : vector<8x8xf32> to vector<8xf32>
    %102 = vector.shape_cast %101 : vector<8xf32> to vector<8x1xf32>
    %103 = vector.broadcast %102 : vector<8x1xf32> to vector<8x8xf32>
    %104 = arith.subf %100, %103 : vector<8x8xf32>
    %105 = math.exp %104 : vector<8x8xf32>
    %cst_39 = arith.constant dense<0.000000e+00> : vector<8xf32>
    %106 = vector.multi_reduction <add>, %105, %cst_39 [1] : vector<8x8xf32> to vector<8xf32>
    %107 = vector.shape_cast %106 : vector<8xf32> to vector<8x1xf32>
    %108 = vector.broadcast %107 : vector<8x1xf32> to vector<8x8xf32>
    %109 = arith.divf %105, %108 : vector<8x8xf32>
    %cst_40 = arith.constant dense<0.000000e+00> : vector<8x32xf32>
    %110 = tpu.matmul %109, %58, %cst_40 {dimension_numbers = #tpu.dot_dimension_numbers<[1], [0], [0], [1], [0, 0, 1, 1], [], []>} : vector<8x8xf32>, vector<8x32xf32>, vector<8x32xf32> -> vector<8x32xf32>
    %111 = vector.broadcast %22 : vector<1x32xf32> to vector<8x32xf32>
    %112 = arith.mulf %111, %110 : vector<8x32xf32>
    %113 = arith.addf %95, %112 : vector<8x32xf32>
    %114 = vector.broadcast %29 : vector<1x32xf32> to vector<8x32xf32>
    %115 = arith.mulf %56, %114 : vector<8x32xf32>
    %cst_41 = arith.constant dense<0.000000e+00> : vector<8x8xf32>
    %116 = tpu.matmul %115, %57, %cst_41 {dimension_numbers = #tpu.dot_dimension_numbers<[1], [1], [0], [0], [0, 0, 1, 0], [], []>} : vector<8x32xf32>, vector<8x32xf32>, vector<8x8xf32> -> vector<8x8xf32>
    %cst_42 = arith.constant 0.353553385 : f32
    %117 = vector.broadcast %cst_42 : f32 to vector<8x8xf32>
    %118 = arith.mulf %116, %117 : vector<8x8xf32>
    %cst_43 = arith.constant dense<0xFF800000> : vector<8xf32>
    %119 = vector.multi_reduction <maximumf>, %118, %cst_43 [1] : vector<8x8xf32> to vector<8xf32>
    %120 = vector.shape_cast %119 : vector<8xf32> to vector<8x1xf32>
    %121 = vector.broadcast %120 : vector<8x1xf32> to vector<8x8xf32>
    %122 = arith.subf %118, %121 : vector<8x8xf32>
    %123 = math.exp %122 : vector<8x8xf32>
    %cst_44 = arith.constant dense<0.000000e+00> : vector<8xf32>
    %124 = vector.multi_reduction <add>, %123, %cst_44 [1] : vector<8x8xf32> to vector<8xf32>
    %125 = vector.shape_cast %124 : vector<8xf32> to vector<8x1xf32>
    %126 = vector.broadcast %125 : vector<8x1xf32> to vector<8x8xf32>
    %127 = arith.divf %123, %126 : vector<8x8xf32>
    %cst_45 = arith.constant dense<0.000000e+00> : vector<8x32xf32>
    %128 = tpu.matmul %127, %58, %cst_45 {dimension_numbers = #tpu.dot_dimension_numbers<[1], [0], [0], [1], [0, 0, 1, 1], [], []>} : vector<8x8xf32>, vector<8x32xf32>, vector<8x32xf32> -> vector<8x32xf32>
    %129 = vector.broadcast %29 : vector<1x32xf32> to vector<8x32xf32>
    %130 = arith.mulf %129, %128 : vector<8x32xf32>
    %131 = arith.addf %113, %130 : vector<8x32xf32>
    %132 = vector.extract_strided_slice %53 {offsets = [8, 0], sizes = [8, 32], strides = [1, 1]} : vector<16x32xf32> to vector<8x32xf32>
    %133 = vector.extract_strided_slice %54 {offsets = [8, 0], sizes = [8, 32], strides = [1, 1]} : vector<16x32xf32> to vector<8x32xf32>
    %134 = vector.extract_strided_slice %55 {offsets = [8, 0], sizes = [8, 32], strides = [1, 1]} : vector<16x32xf32> to vector<8x32xf32>
    %cst_46 = arith.constant 0.000000e+00 : f32
    %135 = vector.broadcast %cst_46 : f32 to vector<8x32xf32>
    %136 = vector.broadcast %8 : vector<1x32xf32> to vector<8x32xf32>
    %137 = arith.mulf %132, %136 : vector<8x32xf32>
    %cst_47 = arith.constant dense<0.000000e+00> : vector<8x8xf32>
    %138 = tpu.matmul %137, %133, %cst_47 {dimension_numbers = #tpu.dot_dimension_numbers<[1], [1], [0], [0], [0, 0, 1, 0], [], []>} : vector<8x32xf32>, vector<8x32xf32>, vector<8x8xf32> -> vector<8x8xf32>
    %cst_48 = arith.constant 0.353553385 : f32
    %139 = vector.broadcast %cst_48 : f32 to vector<8x8xf32>
    %140 = arith.mulf %138, %139 : vector<8x8xf32>
    %cst_49 = arith.constant dense<0xFF800000> : vector<8xf32>
    %141 = vector.multi_reduction <maximumf>, %140, %cst_49 [1] : vector<8x8xf32> to vector<8xf32>
    %142 = vector.shape_cast %141 : vector<8xf32> to vector<8x1xf32>
    %143 = vector.broadcast %142 : vector<8x1xf32> to vector<8x8xf32>
    %144 = arith.subf %140, %143 : vector<8x8xf32>
    %145 = math.exp %144 : vector<8x8xf32>
    %cst_50 = arith.constant dense<0.000000e+00> : vector<8xf32>
    %146 = vector.multi_reduction <add>, %145, %cst_50 [1] : vector<8x8xf32> to vector<8xf32>
    %147 = vector.shape_cast %146 : vector<8xf32> to vector<8x1xf32>
    %148 = vector.broadcast %147 : vector<8x1xf32> to vector<8x8xf32>
    %149 = arith.divf %145, %148 : vector<8x8xf32>
    %cst_51 = arith.constant dense<0.000000e+00> : vector<8x32xf32>
    %150 = tpu.matmul %149, %134, %cst_51 {dimension_numbers = #tpu.dot_dimension_numbers<[1], [0], [0], [1], [0, 0, 1, 1], [], []>} : vector<8x8xf32>, vector<8x32xf32>, vector<8x32xf32> -> vector<8x32xf32>
    %151 = vector.broadcast %8 : vector<1x32xf32> to vector<8x32xf32>
    %152 = arith.mulf %151, %150 : vector<8x32xf32>
    %153 = arith.addf %135, %152 : vector<8x32xf32>
    %154 = vector.broadcast %15 : vector<1x32xf32> to vector<8x32xf32>
    %155 = arith.mulf %132, %154 : vector<8x32xf32>
    %cst_52 = arith.constant dense<0.000000e+00> : vector<8x8xf32>
    %156 = tpu.matmul %155, %133, %cst_52 {dimension_numbers = #tpu.dot_dimension_numbers<[1], [1], [0], [0], [0, 0, 1, 0], [], []>} : vector<8x32xf32>, vector<8x32xf32>, vector<8x8xf32> -> vector<8x8xf32>
    %cst_53 = arith.constant 0.353553385 : f32
    %157 = vector.broadcast %cst_53 : f32 to vector<8x8xf32>
    %158 = arith.mulf %156, %157 : vector<8x8xf32>
    %cst_54 = arith.constant dense<0xFF800000> : vector<8xf32>
    %159 = vector.multi_reduction <maximumf>, %158, %cst_54 [1] : vector<8x8xf32> to vector<8xf32>
    %160 = vector.shape_cast %159 : vector<8xf32> to vector<8x1xf32>
    %161 = vector.broadcast %160 : vector<8x1xf32> to vector<8x8xf32>
    %162 = arith.subf %158, %161 : vector<8x8xf32>
    %163 = math.exp %162 : vector<8x8xf32>
    %cst_55 = arith.constant dense<0.000000e+00> : vector<8xf32>
    %164 = vector.multi_reduction <add>, %163, %cst_55 [1] : vector<8x8xf32> to vector<8xf32>
    %165 = vector.shape_cast %164 : vector<8xf32> to vector<8x1xf32>
    %166 = vector.broadcast %165 : vector<8x1xf32> to vector<8x8xf32>
    %167 = arith.divf %163, %166 : vector<8x8xf32>
    %cst_56 = arith.constant dense<0.000000e+00> : vector<8x32xf32>
    %168 = tpu.matmul %167, %134, %cst_56 {dimension_numbers = #tpu.dot_dimension_numbers<[1], [0], [0], [1], [0, 0, 1, 1], [], []>} : vector<8x8xf32>, vector<8x32xf32>, vector<8x32xf32> -> vector<8x32xf32>
    %169 = vector.broadcast %15 : vector<1x32xf32> to vector<8x32xf32>
    %170 = arith.mulf %169, %168 : vector<8x32xf32>
    %171 = arith.addf %153, %170 : vector<8x32xf32>
    %172 = vector.broadcast %22 : vector<1x32xf32> to vector<8x32xf32>
    %173 = arith.mulf %132, %172 : vector<8x32xf32>
    %cst_57 = arith.constant dense<0.000000e+00> : vector<8x8xf32>
    %174 = tpu.matmul %173, %133, %cst_57 {dimension_numbers = #tpu.dot_dimension_numbers<[1], [1], [0], [0], [0, 0, 1, 0], [], []>} : vector<8x32xf32>, vector<8x32xf32>, vector<8x8xf32> -> vector<8x8xf32>
    %cst_58 = arith.constant 0.353553385 : f32
    %175 = vector.broadcast %cst_58 : f32 to vector<8x8xf32>
    %176 = arith.mulf %174, %175 : vector<8x8xf32>
    %cst_59 = arith.constant dense<0xFF800000> : vector<8xf32>
    %177 = vector.multi_reduction <maximumf>, %176, %cst_59 [1] : vector<8x8xf32> to vector<8xf32>
    %178 = vector.shape_cast %177 : vector<8xf32> to vector<8x1xf32>
    %179 = vector.broadcast %178 : vector<8x1xf32> to vector<8x8xf32>
    %180 = arith.subf %176, %179 : vector<8x8xf32>
    %181 = math.exp %180 : vector<8x8xf32>
    %cst_60 = arith.constant dense<0.000000e+00> : vector<8xf32>
    %182 = vector.multi_reduction <add>, %181, %cst_60 [1] : vector<8x8xf32> to vector<8xf32>
    %183 = vector.shape_cast %182 : vector<8xf32> to vector<8x1xf32>
    %184 = vector.broadcast %183 : vector<8x1xf32> to vector<8x8xf32>
    %185 = arith.divf %181, %184 : vector<8x8xf32>
    %cst_61 = arith.constant dense<0.000000e+00> : vector<8x32xf32>
    %186 = tpu.matmul %185, %134, %cst_61 {dimension_numbers = #tpu.dot_dimension_numbers<[1], [0], [0], [1], [0, 0, 1, 1], [], []>} : vector<8x8xf32>, vector<8x32xf32>, vector<8x32xf32> -> vector<8x32xf32>
    %187 = vector.broadcast %22 : vector<1x32xf32> to vector<8x32xf32>
    %188 = arith.mulf %187, %186 : vector<8x32xf32>
    %189 = arith.addf %171, %188 : vector<8x32xf32>
    %190 = vector.broadcast %29 : vector<1x32xf32> to vector<8x32xf32>
    %191 = arith.mulf %132, %190 : vector<8x32xf32>
    %cst_62 = arith.constant dense<0.000000e+00> : vector<8x8xf32>
    %192 = tpu.matmul %191, %133, %cst_62 {dimension_numbers = #tpu.dot_dimension_numbers<[1], [1], [0], [0], [0, 0, 1, 0], [], []>} : vector<8x32xf32>, vector<8x32xf32>, vector<8x8xf32> -> vector<8x8xf32>
    %cst_63 = arith.constant 0.353553385 : f32
    %193 = vector.broadcast %cst_63 : f32 to vector<8x8xf32>
    %194 = arith.mulf %192, %193 : vector<8x8xf32>
    %cst_64 = arith.constant dense<0xFF800000> : vector<8xf32>
    %195 = vector.multi_reduction <maximumf>, %194, %cst_64 [1] : vector<8x8xf32> to vector<8xf32>
    %196 = vector.shape_cast %195 : vector<8xf32> to vector<8x1xf32>
    %197 = vector.broadcast %196 : vector<8x1xf32> to vector<8x8xf32>
    %198 = arith.subf %194, %197 : vector<8x8xf32>
    %199 = math.exp %198 : vector<8x8xf32>
    %cst_65 = arith.constant dense<0.000000e+00> : vector<8xf32>
    %200 = vector.multi_reduction <add>, %199, %cst_65 [1] : vector<8x8xf32> to vector<8xf32>
    %201 = vector.shape_cast %200 : vector<8xf32> to vector<8x1xf32>
    %202 = vector.broadcast %201 : vector<8x1xf32> to vector<8x8xf32>
    %203 = arith.divf %199, %202 : vector<8x8xf32>
    %cst_66 = arith.constant dense<0.000000e+00> : vector<8x32xf32>
    %204 = tpu.matmul %203, %134, %cst_66 {dimension_numbers = #tpu.dot_dimension_numbers<[1], [0], [0], [1], [0, 0, 1, 1], [], []>} : vector<8x8xf32>, vector<8x32xf32>, vector<8x32xf32> -> vector<8x32xf32>
    %205 = vector.broadcast %29 : vector<1x32xf32> to vector<8x32xf32>
    %206 = arith.mulf %205, %204 : vector<8x32xf32>
    %207 = arith.addf %189, %206 : vector<8x32xf32>
    %208 = tpu.concatenate %131, %207 in 0 : vector<8x32xf32>, vector<8x32xf32> -> vector<16x32xf32>
    %cst_67 = arith.constant dense<0.000000e+00> : vector<16x32xf32>
    %209 = tpu.matmul %208, %35, %cst_67 {dimension_numbers = #tpu.dot_dimension_numbers<[1], [0], [0], [1], [0, 0, 1, 1], [], []>} : vector<16x32xf32>, vector<32x32xf32>, vector<16x32xf32> -> vector<16x32xf32>
    %210 = vector.broadcast %44 : vector<1x32xf32> to vector<16x32xf32>
    %211 = arith.addf %209, %210 : vector<16x32xf32>
    %cst_68 = arith.constant dense<0.000000e+00> : vector<16xf32>
    %212 = vector.multi_reduction <add>, %211, %cst_68 [1] : vector<16x32xf32> to vector<16xf32>
    %213 = vector.shape_cast %212 : vector<16xf32> to vector<16x1xf32>
    %cst_69 = arith.constant 3.200000e+01 : f32
    %214 = vector.broadcast %cst_69 : f32 to vector<16x1xf32>
    %215 = arith.divf %213, %214 : vector<16x1xf32>
    %216 = vector.broadcast %215 : vector<16x1xf32> to vector<16x32xf32>
    %217 = arith.subf %211, %216 : vector<16x32xf32>
    %218 = arith.mulf %217, %217 : vector<16x32xf32>
    %cst_70 = arith.constant dense<0.000000e+00> : vector<16xf32>
    %219 = vector.multi_reduction <add>, %218, %cst_70 [1] : vector<16x32xf32> to vector<16xf32>
    %220 = vector.shape_cast %219 : vector<16xf32> to vector<16x1xf32>
    %cst_71 = arith.constant 3.200000e+01 : f32
    %221 = vector.broadcast %cst_71 : f32 to vector<16x1xf32>
    %222 = arith.divf %220, %221 : vector<16x1xf32>
    %223 = vector.broadcast %215 : vector<16x1xf32> to vector<16x32xf32>
    %224 = arith.subf %211, %223 : vector<16x32xf32>
    %cst_72 = arith.constant 9.99999974E-6 : f32
    %225 = vector.broadcast %cst_72 : f32 to vector<16x1xf32>
    %226 = arith.addf %222, %225 : vector<16x1xf32>
    %227 = math.rsqrt %226 : vector<16x1xf32>
    %228 = vector.broadcast %227 : vector<16x1xf32> to vector<16x32xf32>
    %229 = arith.mulf %224, %228 : vector<16x32xf32>
    %230 = vector.broadcast %46 : vector<1x32xf32> to vector<16x32xf32>
    %231 = arith.mulf %229, %230 : vector<16x32xf32>
    %232 = vector.broadcast %47 : vector<1x32xf32> to vector<16x32xf32>
    %233 = arith.addf %231, %232 : vector<16x32xf32>
    %234 = arith.addf %0, %233 : vector<16x32xf32>
    %cst_73 = arith.constant dense<0.000000e+00> : vector<16x64xf32>
    %235 = tpu.matmul %234, %37, %cst_73 {dimension_numbers = #tpu.dot_dimension_numbers<[1], [0], [0], [1], [0, 0, 1, 1], [], []>} : vector<16x32xf32>, vector<32x64xf32>, vector<16x64xf32> -> vector<16x64xf32>
    %236 = vector.broadcast %39 : vector<1x64xf32> to vector<16x64xf32>
    %237 = arith.addf %235, %236 : vector<16x64xf32>
    %cst_74 = arith.constant 0.000000e+00 : f32
    %238 = vector.broadcast %cst_74 : f32 to vector<16x64xf32>
    %239 = arith.maximumf %237, %238 : vector<16x64xf32>
    %cst_75 = arith.constant dense<0.000000e+00> : vector<16x32xf32>
    %240 = tpu.matmul %239, %41, %cst_75 {dimension_numbers = #tpu.dot_dimension_numbers<[1], [0], [0], [1], [0, 0, 1, 1], [], []>} : vector<16x64xf32>, vector<64x32xf32>, vector<16x32xf32> -> vector<16x32xf32>
    %241 = vector.broadcast %45 : vector<1x32xf32> to vector<16x32xf32>
    %242 = arith.addf %240, %241 : vector<16x32xf32>
    %cst_76 = arith.constant dense<0.000000e+00> : vector<16xf32>
    %243 = vector.multi_reduction <add>, %242, %cst_76 [1] : vector<16x32xf32> to vector<16xf32>
    %244 = vector.shape_cast %243 : vector<16xf32> to vector<16x1xf32>
    %cst_77 = arith.constant 3.200000e+01 : f32
    %245 = vector.broadcast %cst_77 : f32 to vector<16x1xf32>
    %246 = arith.divf %244, %245 : vector<16x1xf32>
    %247 = vector.broadcast %246 : vector<16x1xf32> to vector<16x32xf32>
    %248 = arith.subf %242, %247 : vector<16x32xf32>
    %249 = arith.mulf %248, %248 : vector<16x32xf32>
    %cst_78 = arith.constant dense<0.000000e+00> : vector<16xf32>
    %250 = vector.multi_reduction <add>, %249, %cst_78 [1] : vector<16x32xf32> to vector<16xf32>
    %251 = vector.shape_cast %250 : vector<16xf32> to vector<16x1xf32>
    %cst_79 = arith.constant 3.200000e+01 : f32
    %252 = vector.broadcast %cst_79 : f32 to vector<16x1xf32>
    %253 = arith.divf %251, %252 : vector<16x1xf32>
    %254 = vector.broadcast %246 : vector<16x1xf32> to vector<16x32xf32>
    %255 = arith.subf %242, %254 : vector<16x32xf32>
    %cst_80 = arith.constant 9.99999974E-6 : f32
    %256 = vector.broadcast %cst_80 : f32 to vector<16x1xf32>
    %257 = arith.addf %253, %256 : vector<16x1xf32>
    %258 = math.rsqrt %257 : vector<16x1xf32>
    %259 = vector.broadcast %258 : vector<16x1xf32> to vector<16x32xf32>
    %260 = arith.mulf %255, %259 : vector<16x32xf32>
    %261 = vector.broadcast %48 : vector<1x32xf32> to vector<16x32xf32>
    %262 = arith.mulf %260, %261 : vector<16x32xf32>
    %263 = vector.broadcast %49 : vector<1x32xf32> to vector<16x32xf32>
    %264 = arith.addf %262, %263 : vector<16x32xf32>
    %265 = arith.addf %234, %264 : vector<16x32xf32>
    %c1 = arith.constant 1 : index
    %c0_81 = arith.constant 0 : index
    %c0_82 = arith.constant 0 : index
    %266 = vector.load %arg2[%c1, %c0_81, %c0_82] : memref<2x32x96xf32, #tpu.memory_space<vmem>>, vector<1x32x96xf32>
    %267 = vector.shape_cast %266 : vector<1x32x96xf32> to vector<32x96xf32>
    %c1_83 = arith.constant 1 : index
    %c0_84 = arith.constant 0 : index
    %c0_85 = arith.constant 0 : index
    %268 = vector.load %arg3[%c1_83, %c0_84, %c0_85] : memref<2x1x96xf32, #tpu.memory_space<vmem>>, vector<1x1x96xf32>
    %269 = vector.shape_cast %268 : vector<1x1x96xf32> to vector<1x96xf32>
    %c1_86 = arith.constant 1 : index
    %c0_87 = arith.constant 0 : index
    %c0_88 = arith.constant 0 : index
    %270 = vector.load %arg4[%c1_86, %c0_87, %c0_88] : memref<2x32x32xf32, #tpu.memory_space<vmem>>, vector<1x32x32xf32>
    %271 = vector.shape_cast %270 : vector<1x32x32xf32> to vector<32x32xf32>
    %c1_89 = arith.constant 1 : index
    %c0_90 = arith.constant 0 : index
    %c0_91 = arith.constant 0 : index
    %272 = vector.load %arg5[%c1_89, %c0_90, %c0_91] : memref<2x32x64xf32, #tpu.memory_space<vmem>>, vector<1x32x64xf32>
    %273 = vector.shape_cast %272 : vector<1x32x64xf32> to vector<32x64xf32>
    %c1_92 = arith.constant 1 : index
    %c0_93 = arith.constant 0 : index
    %c0_94 = arith.constant 0 : index
    %274 = vector.load %arg6[%c1_92, %c0_93, %c0_94] : memref<2x1x64xf32, #tpu.memory_space<vmem>>, vector<1x1x64xf32>
    %275 = vector.shape_cast %274 : vector<1x1x64xf32> to vector<1x64xf32>
    %c1_95 = arith.constant 1 : index
    %c0_96 = arith.constant 0 : index
    %c0_97 = arith.constant 0 : index
    %276 = vector.load %arg7[%c1_95, %c0_96, %c0_97] : memref<2x64x32xf32, #tpu.memory_space<vmem>>, vector<1x64x32xf32>
    %277 = vector.shape_cast %276 : vector<1x64x32xf32> to vector<64x32xf32>
    %c1_98 = arith.constant 1 : index
    %c0_99 = arith.constant 0 : index
    %c0_100 = arith.constant 0 : index
    %278 = vector.load %arg8[%c1_98, %c0_99, %c0_100] : memref<2x6x32xf32, #tpu.memory_space<vmem>>, vector<1x6x32xf32>
    %279 = vector.shape_cast %278 : vector<1x6x32xf32> to vector<6x32xf32>
    %280 = vector.extract_strided_slice %279 {offsets = [0, 0], sizes = [1, 32], strides = [1, 1]} : vector<6x32xf32> to vector<1x32xf32>
    %281 = vector.extract_strided_slice %279 {offsets = [1, 0], sizes = [1, 32], strides = [1, 1]} : vector<6x32xf32> to vector<1x32xf32>
    %282 = vector.extract_strided_slice %279 {offsets = [2, 0], sizes = [1, 32], strides = [1, 1]} : vector<6x32xf32> to vector<1x32xf32>
    %283 = vector.extract_strided_slice %279 {offsets = [3, 0], sizes = [1, 32], strides = [1, 1]} : vector<6x32xf32> to vector<1x32xf32>
    %284 = vector.extract_strided_slice %279 {offsets = [4, 0], sizes = [1, 32], strides = [1, 1]} : vector<6x32xf32> to vector<1x32xf32>
    %285 = vector.extract_strided_slice %279 {offsets = [5, 0], sizes = [1, 32], strides = [1, 1]} : vector<6x32xf32> to vector<1x32xf32>
    %cst_101 = arith.constant dense<0.000000e+00> : vector<16x96xf32>
    %286 = tpu.matmul %265, %267, %cst_101 {dimension_numbers = #tpu.dot_dimension_numbers<[1], [0], [0], [1], [0, 0, 1, 1], [], []>} : vector<16x32xf32>, vector<32x96xf32>, vector<16x96xf32> -> vector<16x96xf32>
    %287 = vector.broadcast %269 : vector<1x96xf32> to vector<16x96xf32>
    %288 = arith.addf %286, %287 : vector<16x96xf32>
    %289 = vector.extract_strided_slice %288 {offsets = [0, 0], sizes = [16, 32], strides = [1, 1]} : vector<16x96xf32> to vector<16x32xf32>
    %290 = vector.extract_strided_slice %288 {offsets = [0, 32], sizes = [16, 32], strides = [1, 1]} : vector<16x96xf32> to vector<16x32xf32>
    %291 = vector.extract_strided_slice %288 {offsets = [0, 64], sizes = [16, 32], strides = [1, 1]} : vector<16x96xf32> to vector<16x32xf32>
    %292 = vector.extract_strided_slice %289 {offsets = [0, 0], sizes = [8, 32], strides = [1, 1]} : vector<16x32xf32> to vector<8x32xf32>
    %293 = vector.extract_strided_slice %290 {offsets = [0, 0], sizes = [8, 32], strides = [1, 1]} : vector<16x32xf32> to vector<8x32xf32>
    %294 = vector.extract_strided_slice %291 {offsets = [0, 0], sizes = [8, 32], strides = [1, 1]} : vector<16x32xf32> to vector<8x32xf32>
    %cst_102 = arith.constant 0.000000e+00 : f32
    %295 = vector.broadcast %cst_102 : f32 to vector<8x32xf32>
    %296 = vector.broadcast %8 : vector<1x32xf32> to vector<8x32xf32>
    %297 = arith.mulf %292, %296 : vector<8x32xf32>
    %cst_103 = arith.constant dense<0.000000e+00> : vector<8x8xf32>
    %298 = tpu.matmul %297, %293, %cst_103 {dimension_numbers = #tpu.dot_dimension_numbers<[1], [1], [0], [0], [0, 0, 1, 0], [], []>} : vector<8x32xf32>, vector<8x32xf32>, vector<8x8xf32> -> vector<8x8xf32>
    %cst_104 = arith.constant 0.353553385 : f32
    %299 = vector.broadcast %cst_104 : f32 to vector<8x8xf32>
    %300 = arith.mulf %298, %299 : vector<8x8xf32>
    %cst_105 = arith.constant dense<0xFF800000> : vector<8xf32>
    %301 = vector.multi_reduction <maximumf>, %300, %cst_105 [1] : vector<8x8xf32> to vector<8xf32>
    %302 = vector.shape_cast %301 : vector<8xf32> to vector<8x1xf32>
    %303 = vector.broadcast %302 : vector<8x1xf32> to vector<8x8xf32>
    %304 = arith.subf %300, %303 : vector<8x8xf32>
    %305 = math.exp %304 : vector<8x8xf32>
    %cst_106 = arith.constant dense<0.000000e+00> : vector<8xf32>
    %306 = vector.multi_reduction <add>, %305, %cst_106 [1] : vector<8x8xf32> to vector<8xf32>
    %307 = vector.shape_cast %306 : vector<8xf32> to vector<8x1xf32>
    %308 = vector.broadcast %307 : vector<8x1xf32> to vector<8x8xf32>
    %309 = arith.divf %305, %308 : vector<8x8xf32>
    %cst_107 = arith.constant dense<0.000000e+00> : vector<8x32xf32>
    %310 = tpu.matmul %309, %294, %cst_107 {dimension_numbers = #tpu.dot_dimension_numbers<[1], [0], [0], [1], [0, 0, 1, 1], [], []>} : vector<8x8xf32>, vector<8x32xf32>, vector<8x32xf32> -> vector<8x32xf32>
    %311 = vector.broadcast %8 : vector<1x32xf32> to vector<8x32xf32>
    %312 = arith.mulf %311, %310 : vector<8x32xf32>
    %313 = arith.addf %295, %312 : vector<8x32xf32>
    %314 = vector.broadcast %15 : vector<1x32xf32> to vector<8x32xf32>
    %315 = arith.mulf %292, %314 : vector<8x32xf32>
    %cst_108 = arith.constant dense<0.000000e+00> : vector<8x8xf32>
    %316 = tpu.matmul %315, %293, %cst_108 {dimension_numbers = #tpu.dot_dimension_numbers<[1], [1], [0], [0], [0, 0, 1, 0], [], []>} : vector<8x32xf32>, vector<8x32xf32>, vector<8x8xf32> -> vector<8x8xf32>
    %cst_109 = arith.constant 0.353553385 : f32
    %317 = vector.broadcast %cst_109 : f32 to vector<8x8xf32>
    %318 = arith.mulf %316, %317 : vector<8x8xf32>
    %cst_110 = arith.constant dense<0xFF800000> : vector<8xf32>
    %319 = vector.multi_reduction <maximumf>, %318, %cst_110 [1] : vector<8x8xf32> to vector<8xf32>
    %320 = vector.shape_cast %319 : vector<8xf32> to vector<8x1xf32>
    %321 = vector.broadcast %320 : vector<8x1xf32> to vector<8x8xf32>
    %322 = arith.subf %318, %321 : vector<8x8xf32>
    %323 = math.exp %322 : vector<8x8xf32>
    %cst_111 = arith.constant dense<0.000000e+00> : vector<8xf32>
    %324 = vector.multi_reduction <add>, %323, %cst_111 [1] : vector<8x8xf32> to vector<8xf32>
    %325 = vector.shape_cast %324 : vector<8xf32> to vector<8x1xf32>
    %326 = vector.broadcast %325 : vector<8x1xf32> to vector<8x8xf32>
    %327 = arith.divf %323, %326 : vector<8x8xf32>
    %cst_112 = arith.constant dense<0.000000e+00> : vector<8x32xf32>
    %328 = tpu.matmul %327, %294, %cst_112 {dimension_numbers = #tpu.dot_dimension_numbers<[1], [0], [0], [1], [0, 0, 1, 1], [], []>} : vector<8x8xf32>, vector<8x32xf32>, vector<8x32xf32> -> vector<8x32xf32>
    %329 = vector.broadcast %15 : vector<1x32xf32> to vector<8x32xf32>
    %330 = arith.mulf %329, %328 : vector<8x32xf32>
    %331 = arith.addf %313, %330 : vector<8x32xf32>
    %332 = vector.broadcast %22 : vector<1x32xf32> to vector<8x32xf32>
    %333 = arith.mulf %292, %332 : vector<8x32xf32>
    %cst_113 = arith.constant dense<0.000000e+00> : vector<8x8xf32>
    %334 = tpu.matmul %333, %293, %cst_113 {dimension_numbers = #tpu.dot_dimension_numbers<[1], [1], [0], [0], [0, 0, 1, 0], [], []>} : vector<8x32xf32>, vector<8x32xf32>, vector<8x8xf32> -> vector<8x8xf32>
    %cst_114 = arith.constant 0.353553385 : f32
    %335 = vector.broadcast %cst_114 : f32 to vector<8x8xf32>
    %336 = arith.mulf %334, %335 : vector<8x8xf32>
    %cst_115 = arith.constant dense<0xFF800000> : vector<8xf32>
    %337 = vector.multi_reduction <maximumf>, %336, %cst_115 [1] : vector<8x8xf32> to vector<8xf32>
    %338 = vector.shape_cast %337 : vector<8xf32> to vector<8x1xf32>
    %339 = vector.broadcast %338 : vector<8x1xf32> to vector<8x8xf32>
    %340 = arith.subf %336, %339 : vector<8x8xf32>
    %341 = math.exp %340 : vector<8x8xf32>
    %cst_116 = arith.constant dense<0.000000e+00> : vector<8xf32>
    %342 = vector.multi_reduction <add>, %341, %cst_116 [1] : vector<8x8xf32> to vector<8xf32>
    %343 = vector.shape_cast %342 : vector<8xf32> to vector<8x1xf32>
    %344 = vector.broadcast %343 : vector<8x1xf32> to vector<8x8xf32>
    %345 = arith.divf %341, %344 : vector<8x8xf32>
    %cst_117 = arith.constant dense<0.000000e+00> : vector<8x32xf32>
    %346 = tpu.matmul %345, %294, %cst_117 {dimension_numbers = #tpu.dot_dimension_numbers<[1], [0], [0], [1], [0, 0, 1, 1], [], []>} : vector<8x8xf32>, vector<8x32xf32>, vector<8x32xf32> -> vector<8x32xf32>
    %347 = vector.broadcast %22 : vector<1x32xf32> to vector<8x32xf32>
    %348 = arith.mulf %347, %346 : vector<8x32xf32>
    %349 = arith.addf %331, %348 : vector<8x32xf32>
    %350 = vector.broadcast %29 : vector<1x32xf32> to vector<8x32xf32>
    %351 = arith.mulf %292, %350 : vector<8x32xf32>
    %cst_118 = arith.constant dense<0.000000e+00> : vector<8x8xf32>
    %352 = tpu.matmul %351, %293, %cst_118 {dimension_numbers = #tpu.dot_dimension_numbers<[1], [1], [0], [0], [0, 0, 1, 0], [], []>} : vector<8x32xf32>, vector<8x32xf32>, vector<8x8xf32> -> vector<8x8xf32>
    %cst_119 = arith.constant 0.353553385 : f32
    %353 = vector.broadcast %cst_119 : f32 to vector<8x8xf32>
    %354 = arith.mulf %352, %353 : vector<8x8xf32>
    %cst_120 = arith.constant dense<0xFF800000> : vector<8xf32>
    %355 = vector.multi_reduction <maximumf>, %354, %cst_120 [1] : vector<8x8xf32> to vector<8xf32>
    %356 = vector.shape_cast %355 : vector<8xf32> to vector<8x1xf32>
    %357 = vector.broadcast %356 : vector<8x1xf32> to vector<8x8xf32>
    %358 = arith.subf %354, %357 : vector<8x8xf32>
    %359 = math.exp %358 : vector<8x8xf32>
    %cst_121 = arith.constant dense<0.000000e+00> : vector<8xf32>
    %360 = vector.multi_reduction <add>, %359, %cst_121 [1] : vector<8x8xf32> to vector<8xf32>
    %361 = vector.shape_cast %360 : vector<8xf32> to vector<8x1xf32>
    %362 = vector.broadcast %361 : vector<8x1xf32> to vector<8x8xf32>
    %363 = arith.divf %359, %362 : vector<8x8xf32>
    %cst_122 = arith.constant dense<0.000000e+00> : vector<8x32xf32>
    %364 = tpu.matmul %363, %294, %cst_122 {dimension_numbers = #tpu.dot_dimension_numbers<[1], [0], [0], [1], [0, 0, 1, 1], [], []>} : vector<8x8xf32>, vector<8x32xf32>, vector<8x32xf32> -> vector<8x32xf32>
    %365 = vector.broadcast %29 : vector<1x32xf32> to vector<8x32xf32>
    %366 = arith.mulf %365, %364 : vector<8x32xf32>
    %367 = arith.addf %349, %366 : vector<8x32xf32>
    %368 = vector.extract_strided_slice %289 {offsets = [8, 0], sizes = [8, 32], strides = [1, 1]} : vector<16x32xf32> to vector<8x32xf32>
    %369 = vector.extract_strided_slice %290 {offsets = [8, 0], sizes = [8, 32], strides = [1, 1]} : vector<16x32xf32> to vector<8x32xf32>
    %370 = vector.extract_strided_slice %291 {offsets = [8, 0], sizes = [8, 32], strides = [1, 1]} : vector<16x32xf32> to vector<8x32xf32>
    %cst_123 = arith.constant 0.000000e+00 : f32
    %371 = vector.broadcast %cst_123 : f32 to vector<8x32xf32>
    %372 = vector.broadcast %8 : vector<1x32xf32> to vector<8x32xf32>
    %373 = arith.mulf %368, %372 : vector<8x32xf32>
    %cst_124 = arith.constant dense<0.000000e+00> : vector<8x8xf32>
    %374 = tpu.matmul %373, %369, %cst_124 {dimension_numbers = #tpu.dot_dimension_numbers<[1], [1], [0], [0], [0, 0, 1, 0], [], []>} : vector<8x32xf32>, vector<8x32xf32>, vector<8x8xf32> -> vector<8x8xf32>
    %cst_125 = arith.constant 0.353553385 : f32
    %375 = vector.broadcast %cst_125 : f32 to vector<8x8xf32>
    %376 = arith.mulf %374, %375 : vector<8x8xf32>
    %cst_126 = arith.constant dense<0xFF800000> : vector<8xf32>
    %377 = vector.multi_reduction <maximumf>, %376, %cst_126 [1] : vector<8x8xf32> to vector<8xf32>
    %378 = vector.shape_cast %377 : vector<8xf32> to vector<8x1xf32>
    %379 = vector.broadcast %378 : vector<8x1xf32> to vector<8x8xf32>
    %380 = arith.subf %376, %379 : vector<8x8xf32>
    %381 = math.exp %380 : vector<8x8xf32>
    %cst_127 = arith.constant dense<0.000000e+00> : vector<8xf32>
    %382 = vector.multi_reduction <add>, %381, %cst_127 [1] : vector<8x8xf32> to vector<8xf32>
    %383 = vector.shape_cast %382 : vector<8xf32> to vector<8x1xf32>
    %384 = vector.broadcast %383 : vector<8x1xf32> to vector<8x8xf32>
    %385 = arith.divf %381, %384 : vector<8x8xf32>
    %cst_128 = arith.constant dense<0.000000e+00> : vector<8x32xf32>
    %386 = tpu.matmul %385, %370, %cst_128 {dimension_numbers = #tpu.dot_dimension_numbers<[1], [0], [0], [1], [0, 0, 1, 1], [], []>} : vector<8x8xf32>, vector<8x32xf32>, vector<8x32xf32> -> vector<8x32xf32>
    %387 = vector.broadcast %8 : vector<1x32xf32> to vector<8x32xf32>
    %388 = arith.mulf %387, %386 : vector<8x32xf32>
    %389 = arith.addf %371, %388 : vector<8x32xf32>
    %390 = vector.broadcast %15 : vector<1x32xf32> to vector<8x32xf32>
    %391 = arith.mulf %368, %390 : vector<8x32xf32>
    %cst_129 = arith.constant dense<0.000000e+00> : vector<8x8xf32>
    %392 = tpu.matmul %391, %369, %cst_129 {dimension_numbers = #tpu.dot_dimension_numbers<[1], [1], [0], [0], [0, 0, 1, 0], [], []>} : vector<8x32xf32>, vector<8x32xf32>, vector<8x8xf32> -> vector<8x8xf32>
    %cst_130 = arith.constant 0.353553385 : f32
    %393 = vector.broadcast %cst_130 : f32 to vector<8x8xf32>
    %394 = arith.mulf %392, %393 : vector<8x8xf32>
    %cst_131 = arith.constant dense<0xFF800000> : vector<8xf32>
    %395 = vector.multi_reduction <maximumf>, %394, %cst_131 [1] : vector<8x8xf32> to vector<8xf32>
    %396 = vector.shape_cast %395 : vector<8xf32> to vector<8x1xf32>
    %397 = vector.broadcast %396 : vector<8x1xf32> to vector<8x8xf32>
    %398 = arith.subf %394, %397 : vector<8x8xf32>
    %399 = math.exp %398 : vector<8x8xf32>
    %cst_132 = arith.constant dense<0.000000e+00> : vector<8xf32>
    %400 = vector.multi_reduction <add>, %399, %cst_132 [1] : vector<8x8xf32> to vector<8xf32>
    %401 = vector.shape_cast %400 : vector<8xf32> to vector<8x1xf32>
    %402 = vector.broadcast %401 : vector<8x1xf32> to vector<8x8xf32>
    %403 = arith.divf %399, %402 : vector<8x8xf32>
    %cst_133 = arith.constant dense<0.000000e+00> : vector<8x32xf32>
    %404 = tpu.matmul %403, %370, %cst_133 {dimension_numbers = #tpu.dot_dimension_numbers<[1], [0], [0], [1], [0, 0, 1, 1], [], []>} : vector<8x8xf32>, vector<8x32xf32>, vector<8x32xf32> -> vector<8x32xf32>
    %405 = vector.broadcast %15 : vector<1x32xf32> to vector<8x32xf32>
    %406 = arith.mulf %405, %404 : vector<8x32xf32>
    %407 = arith.addf %389, %406 : vector<8x32xf32>
    %408 = vector.broadcast %22 : vector<1x32xf32> to vector<8x32xf32>
    %409 = arith.mulf %368, %408 : vector<8x32xf32>
    %cst_134 = arith.constant dense<0.000000e+00> : vector<8x8xf32>
    %410 = tpu.matmul %409, %369, %cst_134 {dimension_numbers = #tpu.dot_dimension_numbers<[1], [1], [0], [0], [0, 0, 1, 0], [], []>} : vector<8x32xf32>, vector<8x32xf32>, vector<8x8xf32> -> vector<8x8xf32>
    %cst_135 = arith.constant 0.353553385 : f32
    %411 = vector.broadcast %cst_135 : f32 to vector<8x8xf32>
    %412 = arith.mulf %410, %411 : vector<8x8xf32>
    %cst_136 = arith.constant dense<0xFF800000> : vector<8xf32>
    %413 = vector.multi_reduction <maximumf>, %412, %cst_136 [1] : vector<8x8xf32> to vector<8xf32>
    %414 = vector.shape_cast %413 : vector<8xf32> to vector<8x1xf32>
    %415 = vector.broadcast %414 : vector<8x1xf32> to vector<8x8xf32>
    %416 = arith.subf %412, %415 : vector<8x8xf32>
    %417 = math.exp %416 : vector<8x8xf32>
    %cst_137 = arith.constant dense<0.000000e+00> : vector<8xf32>
    %418 = vector.multi_reduction <add>, %417, %cst_137 [1] : vector<8x8xf32> to vector<8xf32>
    %419 = vector.shape_cast %418 : vector<8xf32> to vector<8x1xf32>
    %420 = vector.broadcast %419 : vector<8x1xf32> to vector<8x8xf32>
    %421 = arith.divf %417, %420 : vector<8x8xf32>
    %cst_138 = arith.constant dense<0.000000e+00> : vector<8x32xf32>
    %422 = tpu.matmul %421, %370, %cst_138 {dimension_numbers = #tpu.dot_dimension_numbers<[1], [0], [0], [1], [0, 0, 1, 1], [], []>} : vector<8x8xf32>, vector<8x32xf32>, vector<8x32xf32> -> vector<8x32xf32>
    %423 = vector.broadcast %22 : vector<1x32xf32> to vector<8x32xf32>
    %424 = arith.mulf %423, %422 : vector<8x32xf32>
    %425 = arith.addf %407, %424 : vector<8x32xf32>
    %426 = vector.broadcast %29 : vector<1x32xf32> to vector<8x32xf32>
    %427 = arith.mulf %368, %426 : vector<8x32xf32>
    %cst_139 = arith.constant dense<0.000000e+00> : vector<8x8xf32>
    %428 = tpu.matmul %427, %369, %cst_139 {dimension_numbers = #tpu.dot_dimension_numbers<[1], [1], [0], [0], [0, 0, 1, 0], [], []>} : vector<8x32xf32>, vector<8x32xf32>, vector<8x8xf32> -> vector<8x8xf32>
    %cst_140 = arith.constant 0.353553385 : f32
    %429 = vector.broadcast %cst_140 : f32 to vector<8x8xf32>
    %430 = arith.mulf %428, %429 : vector<8x8xf32>
    %cst_141 = arith.constant dense<0xFF800000> : vector<8xf32>
    %431 = vector.multi_reduction <maximumf>, %430, %cst_141 [1] : vector<8x8xf32> to vector<8xf32>
    %432 = vector.shape_cast %431 : vector<8xf32> to vector<8x1xf32>
    %433 = vector.broadcast %432 : vector<8x1xf32> to vector<8x8xf32>
    %434 = arith.subf %430, %433 : vector<8x8xf32>
    %435 = math.exp %434 : vector<8x8xf32>
    %cst_142 = arith.constant dense<0.000000e+00> : vector<8xf32>
    %436 = vector.multi_reduction <add>, %435, %cst_142 [1] : vector<8x8xf32> to vector<8xf32>
    %437 = vector.shape_cast %436 : vector<8xf32> to vector<8x1xf32>
    %438 = vector.broadcast %437 : vector<8x1xf32> to vector<8x8xf32>
    %439 = arith.divf %435, %438 : vector<8x8xf32>
    %cst_143 = arith.constant dense<0.000000e+00> : vector<8x32xf32>
    %440 = tpu.matmul %439, %370, %cst_143 {dimension_numbers = #tpu.dot_dimension_numbers<[1], [0], [0], [1], [0, 0, 1, 1], [], []>} : vector<8x8xf32>, vector<8x32xf32>, vector<8x32xf32> -> vector<8x32xf32>
    %441 = vector.broadcast %29 : vector<1x32xf32> to vector<8x32xf32>
    %442 = arith.mulf %441, %440 : vector<8x32xf32>
    %443 = arith.addf %425, %442 : vector<8x32xf32>
    %444 = tpu.concatenate %367, %443 in 0 : vector<8x32xf32>, vector<8x32xf32> -> vector<16x32xf32>
    %cst_144 = arith.constant dense<0.000000e+00> : vector<16x32xf32>
    %445 = tpu.matmul %444, %271, %cst_144 {dimension_numbers = #tpu.dot_dimension_numbers<[1], [0], [0], [1], [0, 0, 1, 1], [], []>} : vector<16x32xf32>, vector<32x32xf32>, vector<16x32xf32> -> vector<16x32xf32>
    %446 = vector.broadcast %280 : vector<1x32xf32> to vector<16x32xf32>
    %447 = arith.addf %445, %446 : vector<16x32xf32>
    %cst_145 = arith.constant dense<0.000000e+00> : vector<16xf32>
    %448 = vector.multi_reduction <add>, %447, %cst_145 [1] : vector<16x32xf32> to vector<16xf32>
    %449 = vector.shape_cast %448 : vector<16xf32> to vector<16x1xf32>
    %cst_146 = arith.constant 3.200000e+01 : f32
    %450 = vector.broadcast %cst_146 : f32 to vector<16x1xf32>
    %451 = arith.divf %449, %450 : vector<16x1xf32>
    %452 = vector.broadcast %451 : vector<16x1xf32> to vector<16x32xf32>
    %453 = arith.subf %447, %452 : vector<16x32xf32>
    %454 = arith.mulf %453, %453 : vector<16x32xf32>
    %cst_147 = arith.constant dense<0.000000e+00> : vector<16xf32>
    %455 = vector.multi_reduction <add>, %454, %cst_147 [1] : vector<16x32xf32> to vector<16xf32>
    %456 = vector.shape_cast %455 : vector<16xf32> to vector<16x1xf32>
    %cst_148 = arith.constant 3.200000e+01 : f32
    %457 = vector.broadcast %cst_148 : f32 to vector<16x1xf32>
    %458 = arith.divf %456, %457 : vector<16x1xf32>
    %459 = vector.broadcast %451 : vector<16x1xf32> to vector<16x32xf32>
    %460 = arith.subf %447, %459 : vector<16x32xf32>
    %cst_149 = arith.constant 9.99999974E-6 : f32
    %461 = vector.broadcast %cst_149 : f32 to vector<16x1xf32>
    %462 = arith.addf %458, %461 : vector<16x1xf32>
    %463 = math.rsqrt %462 : vector<16x1xf32>
    %464 = vector.broadcast %463 : vector<16x1xf32> to vector<16x32xf32>
    %465 = arith.mulf %460, %464 : vector<16x32xf32>
    %466 = vector.broadcast %282 : vector<1x32xf32> to vector<16x32xf32>
    %467 = arith.mulf %465, %466 : vector<16x32xf32>
    %468 = vector.broadcast %283 : vector<1x32xf32> to vector<16x32xf32>
    %469 = arith.addf %467, %468 : vector<16x32xf32>
    %470 = arith.addf %265, %469 : vector<16x32xf32>
    %cst_150 = arith.constant dense<0.000000e+00> : vector<16x64xf32>
    %471 = tpu.matmul %470, %273, %cst_150 {dimension_numbers = #tpu.dot_dimension_numbers<[1], [0], [0], [1], [0, 0, 1, 1], [], []>} : vector<16x32xf32>, vector<32x64xf32>, vector<16x64xf32> -> vector<16x64xf32>
    %472 = vector.broadcast %275 : vector<1x64xf32> to vector<16x64xf32>
    %473 = arith.addf %471, %472 : vector<16x64xf32>
    %cst_151 = arith.constant 0.000000e+00 : f32
    %474 = vector.broadcast %cst_151 : f32 to vector<16x64xf32>
    %475 = arith.maximumf %473, %474 : vector<16x64xf32>
    %cst_152 = arith.constant dense<0.000000e+00> : vector<16x32xf32>
    %476 = tpu.matmul %475, %277, %cst_152 {dimension_numbers = #tpu.dot_dimension_numbers<[1], [0], [0], [1], [0, 0, 1, 1], [], []>} : vector<16x64xf32>, vector<64x32xf32>, vector<16x32xf32> -> vector<16x32xf32>
    %477 = vector.broadcast %281 : vector<1x32xf32> to vector<16x32xf32>
    %478 = arith.addf %476, %477 : vector<16x32xf32>
    %cst_153 = arith.constant dense<0.000000e+00> : vector<16xf32>
    %479 = vector.multi_reduction <add>, %478, %cst_153 [1] : vector<16x32xf32> to vector<16xf32>
    %480 = vector.shape_cast %479 : vector<16xf32> to vector<16x1xf32>
    %cst_154 = arith.constant 3.200000e+01 : f32
    %481 = vector.broadcast %cst_154 : f32 to vector<16x1xf32>
    %482 = arith.divf %480, %481 : vector<16x1xf32>
    %483 = vector.broadcast %482 : vector<16x1xf32> to vector<16x32xf32>
    %484 = arith.subf %478, %483 : vector<16x32xf32>
    %485 = arith.mulf %484, %484 : vector<16x32xf32>
    %cst_155 = arith.constant dense<0.000000e+00> : vector<16xf32>
    %486 = vector.multi_reduction <add>, %485, %cst_155 [1] : vector<16x32xf32> to vector<16xf32>
    %487 = vector.shape_cast %486 : vector<16xf32> to vector<16x1xf32>
    %cst_156 = arith.constant 3.200000e+01 : f32
    %488 = vector.broadcast %cst_156 : f32 to vector<16x1xf32>
    %489 = arith.divf %487, %488 : vector<16x1xf32>
    %490 = vector.broadcast %482 : vector<16x1xf32> to vector<16x32xf32>
    %491 = arith.subf %478, %490 : vector<16x32xf32>
    %cst_157 = arith.constant 9.99999974E-6 : f32
    %492 = vector.broadcast %cst_157 : f32 to vector<16x1xf32>
    %493 = arith.addf %489, %492 : vector<16x1xf32>
    %494 = math.rsqrt %493 : vector<16x1xf32>
    %495 = vector.broadcast %494 : vector<16x1xf32> to vector<16x32xf32>
    %496 = arith.mulf %491, %495 : vector<16x32xf32>
    %497 = vector.broadcast %284 : vector<1x32xf32> to vector<16x32xf32>
    %498 = arith.mulf %496, %497 : vector<16x32xf32>
    %499 = vector.broadcast %285 : vector<1x32xf32> to vector<16x32xf32>
    %500 = arith.addf %498, %499 : vector<16x32xf32>
    %501 = arith.addf %470, %500 : vector<16x32xf32>
    %c0_158 = arith.constant 0 : index
    %c0_159 = arith.constant 0 : index
    %502 = vector.load %arg9[%c0_158, %c0_159] : memref<16x32xf32, #tpu.memory_space<vmem>>, vector<16x32xf32>
    tpu.vector_store %arg9[%c0_158, %c0_159], %501 {strides = array<i32>} : memref<16x32xf32, #tpu.memory_space<vmem>>, vector<16x32xf32>,
    return
  }
  func.func @transform_0(%arg0: i32) -> (i32, i32) {
    %c0_i32 = arith.constant 0 : i32
    %c0_i32_0 = arith.constant 0 : i32
    %c0_i32_1 = arith.constant 0 : i32
    return %c0_i32, %c0_i32_0 : i32, i32
  }
  func.func @transform_1(%arg0: i32) -> (i32, i32, i32) {
    %c0_i32 = arith.constant 0 : i32
    %c0_i32_0 = arith.constant 0 : i32
    %c0_i32_1 = arith.constant 0 : i32
    %c0_i32_2 = arith.constant 0 : i32
    return %c0_i32, %c0_i32_0, %c0_i32_1 : i32, i32, i32
  }
  func.func @transform_2(%arg0: i32) -> (i32, i32, i32) {
    %c0_i32 = arith.constant 0 : i32
    %c0_i32_0 = arith.constant 0 : i32
    %c0_i32_1 = arith.constant 0 : i32
    %c0_i32_2 = arith.constant 0 : i32
    return %c0_i32, %c0_i32_0, %c0_i32_1 : i32, i32, i32
  }
  func.func @transform_3(%arg0: i32) -> (i32, i32, i32) {
    %c0_i32 = arith.constant 0 : i32
    %c0_i32_0 = arith.constant 0 : i32
    %c0_i32_1 = arith.constant 0 : i32
    %c0_i32_2 = arith.constant 0 : i32
    return %c0_i32, %c0_i32_0, %c0_i32_1 : i32, i32, i32
  }
  func.func @transform_4(%arg0: i32) -> (i32, i32, i32) {
    %c0_i32 = arith.constant 0 : i32
    %c0_i32_0 = arith.constant 0 : i32
    %c0_i32_1 = arith.constant 0 : i32
    %c0_i32_2 = arith.constant 0 : i32
    return %c0_i32, %c0_i32_0, %c0_i32_1 : i32, i32, i32
  }
  func.func @transform_5(%arg0: i32) -> (i32, i32, i32) {
    %c0_i32 = arith.constant 0 : i32
    %c0_i32_0 = arith.constant 0 : i32
    %c0_i32_1 = arith.constant 0 : i32
    %c0_i32_2 = arith.constant 0 : i32
    return %c0_i32, %c0_i32_0, %c0_i32_1 : i32, i32, i32
  }
  func.func @transform_6(%arg0: i32) -> (i32, i32, i32) {
    %c0_i32 = arith.constant 0 : i32
    %c0_i32_0 = arith.constant 0 : i32
    %c0_i32_1 = arith.constant 0 : i32
    %c0_i32_2 = arith.constant 0 : i32
    return %c0_i32, %c0_i32_0, %c0_i32_1 : i32, i32, i32
  }
  func.func @transform_7(%arg0: i32) -> (i32, i32, i32) {
    %c0_i32 = arith.constant 0 : i32
    %c0_i32_0 = arith.constant 0 : i32
    %c0_i32_1 = arith.constant 0 : i32
    %c0_i32_2 = arith.constant 0 : i32
    return %c0_i32, %c0_i32_0, %c0_i32_1 : i32, i32, i32
  }
  func.func @transform_8(%arg0: i32) -> (i32, i32) {
    %c0_i32 = arith.constant 0 : i32
    %c0_i32_0 = arith.constant 0 : i32
    %c0_i32_1 = arith.constant 0 : i32
    return %c0_i32, %c0_i32_0 : i32, i32
  }
}

</mosaic_0001>

<bundles_post_ra>
// kernel: transformer_encoder.1
= control target key start
LH: loop header
LB: loop body
LE: loop exit
PB: predicated region body
PF: predicated region fallthrough
CT: control target
= control target key end

     0   :  { %vm83_vm0 = vcmask 261120   ;;  %s4851_s0 = inlined_call_operand.vmem [shape: f32[16,32], index: 0, kind: input, shape index: {}]   ;;  %s4852_s1 = inlined_call_operand.vmem [shape: f32[2,32,96], index: 1, kind: input, shape index: {}]   ;;  %s4853_s2 = inlined_call_operand.vmem [shape: f32[2,1,96], index: 2, kind: input, shape index: {}]   ;;  %s4854_s3 = inlined_call_operand.vmem [shape: f32[2,32,32], index: 3, kind: input, shape index: {}]   ;;  %s4855_s4 = inlined_call_operand.vmem [shape: f32[2,32,64], index: 4, kind: input, shape index: {}]   ;;  %s4856_s5 = inlined_call_operand.vmem [shape: f32[2,1,64], index: 5, kind: input, shape index: {}]   ;;  %s4857_s6 = inlined_call_operand.vmem [shape: f32[2,64,32], index: 6, kind: input, shape index: {}]   ;;  %s4858_s7 = inlined_call_operand.vmem [shape: f32[2,6,32], index: 7, kind: input, shape index: {}]   ;;  %s4859_s8 = inlined_call_operand.hbm [shape: f32[16,32], index: 8, kind: output, shape index: {}]  }
   0x1   :  { %v54_v0 = vld [vmem:[%s4852_s1] sm:$0xff]  ;;  %v55_v1 = vld [vmem:[%s4852_s1 + $0x8] sm:$0xff]  ;;  %v56_v2 = vld [vmem:[%s4852_s1 + $0x10] sm:$0xff] }
   0x2   :  { %v4068_v3 = vpack.c.bf16 %v55_v1, %v54_v0  ;;  %v57_v4 = vld [vmem:[%s4852_s1 + $0x18] sm:$0xff]  ;;  %v4326_v5 = vld [vmem:[%s4851_s0] sm:$0xff] }
   0x3   :  { %v4072_v6 = vpack.c.bf16 %v57_v4, %v56_v2  ;;  %3812 = vmatprep.mubr.msk.f32.mxu1 %vm83_vm0, %v4326_v5 }
   0x4   :  { %13 = vsyncpa [#allocation3], 0  ;;  %4069 = vmatprep.subr.bf16.mxu1 %v4068_v3  ;;  %v4333_v7 = vld [vmem:[%s4851_s0 + $0x8] sm:$0xff]  ;;  %v4259_v8 = vmov 0.0   ;;  %vm4260_vm1 = vmmov 0   ;;  %s4261_s0 = smov 96   ;;  %v32_v14 = vlaneseq }
   0x5   :  { %4071 = vmatpush3.bf16.msra.mxu1 %v4068_v3  ;;  %3825 = vmatprep.subr.mxu0 %v4259_v8  ;;  %v3593_v9 = vld [vmem:[%s4853_s2] ss:$0 sm:$0xff]  ;;  %vm245_vm12 = vcmask 64512   ;;  %s4262_s19 = smov 64   ;;  %vm1689_vm13 = vcmask 523264  }
   0x6   :  { %4073 = vmatprep.subr.bf16.mxu1 %v4072_v6  ;;  %3827 = vmatprep.mubr.msk.f32.mxu0 %vm4260_vm1, %v4259_v8  ;;  %v33_v15 = vand.u32 127, %v32_v14 }
   0x8   :  { %vm39_vm2 = vcmp.ge.s32.totalorder %v33_v15, 8  ;;  %vm40_vm3 = vcmp.lt.s32.totalorder %v33_v15, 16  ;;  %vm35_vm4 = vcmp.lt.s32.totalorder %v33_v15, 8  ;;  %vm44_vm6 = vcmp.ge.s32.totalorder %v33_v15, 16 }
   0x9   :  { %4075 = vmatpush3.bf16.msra.mxu1 %v4072_v6  ;;  %vm41_vm5 = vmand %vm39_vm2, %vm40_vm3  ;;  %vm45_vm7 = vcmp.lt.s32.totalorder %v33_v15, 24  ;;  %v4356_v16 = vsel %vm35_vm4, 1.0, %v4259_v8  ;;  %vm49_vm9 = vcmp.ge.s32.totalorder %v33_v15, 24  ;;  %vm50_vm10 = vcmp.lt.s32.totalorder %v33_v15, 32 }
   0xa   :  { %3815 = vmatprep.subr.mxu1 %v4259_v8  ;;  %v4359_v17 = vsel %vm41_vm5, 1.0, %v4259_v8  ;;  %vm46_vm8 = vmand %vm44_vm6, %vm45_vm7 }
   0xb   :  { %v4370_v21 = vsel %vm46_vm8, 1.0, %v4259_v8  ;;  %vm51_vm11 = vmand %vm49_vm9, %vm50_vm10 }
   0xc   :  { %3813 = vmatmul.mubr.msk.f32.vlgmr.msra.gmra.mrb[0].mxu1 %vm83_vm0, %v4333_v7  ;;  %v4383_v23 = vsel %vm51_vm11, 1.0, %v4259_v8 }
   0xd   :  { %3817 = vmatprep.mubr.msk.f32.mxu1 %vm4260_vm1, %v4259_v8 }
  0xdf   :  { %v3814_v10 = vpop.f32.mrb[0].mxu1 }
  0xe0   :  { %v156_v11 = vpop.f32.mrb[1].mxu1  ;;  %v4350_v13 = vadd.f32 %v3814_v10, %v3593_v9 }
  0xe1   :  { %v4346_v12 = vadd.f32 %v3593_v9, %v156_v11 }
  0xe2   :  { %v818_v26 = vmul.f32 %v4356_v16, %v4350_v13  ;;  %v987_v27 = vmul.f32 %v4359_v17, %v4350_v13  ;;  %v1148_v28 = vmul.f32 %v4370_v21, %v4350_v13  ;;  %v1309_v29 = vmul.f32 %v4383_v23, %v4350_v13 }
  0xe3   :  { %167 = vrot.lane.b32.xlu0 %v4346_v12, %s4261_s0  ;;  %v165_v19 = vmul.f32 %v4356_v16, %v4346_v12  ;;  %v335_v20 = vmul.f32 %v4359_v17, %v4346_v12  ;;  %v496_v22 = vmul.f32 %v4370_v21, %v4346_v12  ;;  %v657_v24 = vmul.f32 %v4383_v23, %v4346_v12 }
  0xe7   :  { %820 = vrot.lane.b32.xlu0 %v4350_v13, %s4261_s0 }
 0x155   :  { %v168_v18 = vpop.permute.xlu0 %167 }
 0x156   :  { %3816 = vmatpush3.xpose.msk.msra.mxu1 %vm83_vm0, %v168_v18  ;;  %3826 = vmatpush3.xpose.msk.msra.mxu0 %vm83_vm0, %v168_v18 }
 0x157   :  { %3835 = vmatprep.subr.mxu0 %v4259_v8  ;;  %3820 = vmatprep.subr.mxu1 %v4259_v8 }
 0x159   :  { %3818 = vmatmul.mubr.msk.f32.vlgmr.msra.gmra.mrb[2].mxu1 %vm83_vm0, %v165_v19  ;;  %3828 = vmatmul.mubr.msk.f32.vlgmr.msra.gmra.mrb[0].mxu0 %vm83_vm0, %v335_v20  ;;  %v821_v25 = vpop.permute.xlu0 %820 }
 0x15a   :  { %3836 = vmatpush3.xpose.msk.msra.mxu0 %vm83_vm0, %v168_v18  ;;  %3837 = vmatprep.mubr.msk.f32.mxu0 %vm4260_vm1, %v4259_v8 }
 0x15b   :  { %3845 = vmatprep.subr.mxu0 %v4259_v8  ;;  %3822 = vmatprep.mubr.msk.f32.mxu1 %vm4260_vm1, %v4259_v8 }
 0x15d   :  { %3838 = vmatmul.mubr.msk.f32.vlgmr.msra.gmra.mrb[2].mxu0 %vm83_vm0, %v496_v22 }
 0x15e   :  { %3846 = vmatpush3.xpose.msk.msra.mxu0 %vm83_vm0, %v168_v18  ;;  %3847 = vmatprep.mubr.msk.f32.mxu0 %vm4260_vm1, %v4259_v8 }
 0x15f   :  { %3855 = vmatprep.subr.mxu0 %v4259_v8 }
 0x161   :  { %3848 = vmatmul.mubr.msk.f32.vlgmr.msra.gmra.mrb[4].mxu0 %vm83_vm0, %v657_v24 }
 0x162   :  { %3856 = vmatpush3.xpose.msk.msra.mxu0 %vm83_vm0, %v821_v25  ;;  %3857 = vmatprep.mubr.msk.f32.mxu0 %vm4260_vm1, %v4259_v8 }
 0x163   :  { %3865 = vmatprep.subr.mxu0 %v4259_v8 }
 0x165   :  { %3858 = vmatmul.mubr.msk.f32.vlgmr.msra.gmra.mrb[6].mxu0 %vm83_vm0, %v818_v26 }
 0x166   :  { %3866 = vmatpush3.xpose.msk.msra.mxu0 %vm83_vm0, %v821_v25  ;;  %3867 = vmatprep.mubr.msk.f32.mxu0 %vm4260_vm1, %v4259_v8 }
 0x167   :  { %3875 = vmatprep.subr.mxu0 %v4259_v8 }
 0x169   :  { %3868 = vmatmul.mubr.msk.f32.vlgmr.msra.gmra.mrb[8].mxu0 %vm83_vm0, %v987_v27 }
 0x16a   :  { %3876 = vmatpush3.xpose.msk.msra.mxu0 %vm83_vm0, %v821_v25  ;;  %3877 = vmatprep.mubr.msk.f32.mxu0 %vm4260_vm1, %v4259_v8 }
 0x16b   :  { %3885 = vmatprep.subr.mxu0 %v4259_v8 }
 0x16d   :  { %3878 = vmatmul.mubr.msk.f32.vlgmr.msra.gmra.mrb[10].mxu0 %vm83_vm0, %v1148_v28 }
 0x16e   :  { %3886 = vmatpush3.xpose.msk.msra.mxu0 %vm83_vm0, %v821_v25  ;;  %3887 = vmatprep.mubr.msk.f32.mxu0 %vm4260_vm1, %v4259_v8 }
 0x171   :  { %3888 = vmatmul.mubr.msk.f32.vlgmr.msra.gmra.mrb[12].mxu0 %vm83_vm0, %v1309_v29 }
 0x22c   :  { %v240_v30 = vpop.f32.mrb[2].mxu1  ;;  %v405_v31 = vpop.f32.mrb[0].mxu0 }
 0x22d   :  { %v244_v32 = vmul.f32 0.35355338, %v240_v30  ;;  %v3819_v33 = vpop.f32.mrb[3].mxu1  ;;  %v3829_v34 = vpop.f32.mrb[1].mxu0  ;;  %v409_v35 = vmul.f32 0.35355338, %v405_v31 }
 0x22f   :  { %v246_v36 = vsel %vm245_vm12, %v244_v32, -inf  ;;  %v410_v41 = vsel %vm245_vm12, %v409_v35, -inf }
 0x230   :  { %v566_v37 = vpop.f32.mrb[2].mxu0  ;;  %247 = vmax.xlane.f32.xlu1 %v246_v36 }
 0x231   :  { %v570_v38 = vmul.f32 0.35355338, %v566_v37  ;;  %v3839_v39 = vpop.f32.mrb[3].mxu0 }
 0x233   :  { %v571_v40 = vsel %vm245_vm12, %v570_v38, -inf }
 0x234   :  { %572 = vmax.xlane.f32.xlu0 %v571_v40  ;;  %v727_v42 = vpop.f32.mrb[4].mxu0  ;;  %411 = vmax.xlane.f32.xlu1 %v410_v41 }
 0x235   :  { %v731_v43 = vmul.f32 0.35355338, %v727_v42  ;;  %v3849_v44 = vpop.f32.mrb[5].mxu0 }
 0x237   :  { %v732_v45 = vsel %vm245_vm12, %v731_v43, -inf }
 0x238   :  { %v893_v46 = vpop.f32.mrb[6].mxu0  ;;  %733 = vmax.xlane.f32.xlu1 %v732_v45 }
 0x239   :  { %v897_v47 = vmul.f32 0.35355338, %v893_v46  ;;  %v3859_v48 = vpop.f32.mrb[7].mxu0 }
 0x23b   :  { %v898_v49 = vsel %vm245_vm12, %v897_v47, -inf }
 0x23c   :  { %v1057_v50 = vpop.f32.mrb[8].mxu0  ;;  %899 = vmax.xlane.f32.xlu1 %v898_v49 }
 0x23d   :  { %v1061_v51 = vmul.f32 0.35355338, %v1057_v50  ;;  %v3869_v52 = vpop.f32.mrb[9].mxu0 }
 0x23f   :  { %v1062_v53 = vsel %vm245_vm12, %v1061_v51, -inf }
 0x240   :  { %v1218_v54 = vpop.f32.mrb[10].mxu0  ;;  %1063 = vmax.xlane.f32.xlu1 %v1062_v53 }
 0x241   :  { %v1222_v55 = vmul.f32 0.35355338, %v1218_v54  ;;  %v3879_v56 = vpop.f32.mrb[11].mxu0 }
 0x243   :  { %v1223_v57 = vsel %vm245_vm12, %v1222_v55, -inf }
 0x244   :  { %v1379_v58 = vpop.f32.mrb[12].mxu0  ;;  %1224 = vmax.xlane.f32.xlu1 %v1223_v57 }
 0x245   :  { %v1383_v59 = vmul.f32 0.35355338, %v1379_v58  ;;  %v3889_v60 = vpop.f32.mrb[13].mxu0 }
 0x247   :  { %v1384_v61 = vsel %vm245_vm12, %v1383_v59, -inf }
 0x248   :  { %1385 = vmax.xlane.f32.xlu1 %v1384_v61 }
 0x2bd   :  { %v248_v62 = vpop.xlane.xlu1 %247 }
 0x2be   :  { %v249_v63 = vsub.f32 %v244_v32, %v248_v62 }
 0x2c0   :  { %v250_v0 = vmul.f32 1.442695, %v249_v63 }
 0x2c1   :  { %v573_v1 = vpop.xlane.xlu0 %572  ;;  %v412_v2 = vpop.xlane.xlu1 %411 }
 0x2c2   :  { %4155 = vpow2.f32 %v250_v0  ;;  %v574_v3 = vsub.f32 %v570_v38, %v573_v1  ;;  %v413_v4 = vsub.f32 %v409_v35, %v412_v2 }
 0x2c4   :  { %v414_v6 = vmul.f32 1.442695, %v413_v4  ;;  %v575_v9 = vmul.f32 1.442695, %v574_v3 }
 0x2c5   :  { %v734_v10 = vpop.xlane.xlu1 %733 }
 0x2c6   :  { %v735_v11 = vsub.f32 %v731_v43, %v734_v10  ;;  %4157 = vpow2.f32 %v414_v6 }
 0x2c7   :  { %4159 = vpow2.f32 %v575_v9 }
 0x2c8   :  { %v736_v15 = vmul.f32 1.442695, %v735_v11  ;;  %v59_v11 = vld [vmem:[%s4854_s3] sm:$0xff] }
 0x2c9   :  { %v900_v18 = vpop.xlane.xlu1 %899 }
 0x2ca   :  { %4161 = vpow2.f32 %v736_v15  ;;  %v901_v19 = vsub.f32 %v897_v47, %v900_v18  ;;  %v60_v15 = vld [vmem:[%s4854_s3 + $0x8] sm:$0xff] }
 0x2cb   :  { %v4076_v18 = vpack.c.bf16 %v60_v15, %v59_v11  ;;  %v64_v11 = vld [vmem:[%s4855_s4 + $0x8] sm:$0xff] }
 0x2cc   :  { %v4156_v20 = vpop.eup %4155  ;;  %v902_v22 = vmul.f32 1.442695, %v901_v19  ;;  %v61_v19 = vld [vmem:[%s4854_s3 + $0x10] sm:$0xff] }
 0x2cd   :  { %v1064_v24 = vpop.xlane.xlu1 %1063  ;;  %v252_v25 = vsel %vm245_vm12, %v4156_v20, 0.0  ;;  %4077 = vmatprep.subr.bf16.mxu0 %v4076_v18 }
 0x2ce   :  { %4163 = vpow2.f32 %v902_v22  ;;  %v1065_v26 = vsub.f32 %v1061_v51, %v1064_v24  ;;  %253 = vadd.xlane.f32.xlu1 %v252_v25  ;;  %4079 = vmatpush3.bf16.msra.mxu0 %v4076_v18  ;;  %v65_v18 = vld [vmem:[%s4855_s4 + $0x10] sm:$0xff] }
 0x2d0   :  { %v1066_v27 = vmul.f32 1.442695, %v1065_v26  ;;  %v4158_v28 = vpop.eup %4157 }
 0x2d1   :  { %v1225_v29 = vpop.xlane.xlu1 %1224  ;;  %v416_v31 = vsel %vm245_vm12, %v4158_v28, 0.0  ;;  %v4160_v32 = vpop.eup %4159 }
 0x2d2   :  { %4165 = vpow2.f32 %v1066_v27  ;;  %v1226_v30 = vsub.f32 %v1222_v55, %v1225_v29  ;;  %417 = vadd.xlane.f32.xlu1 %v416_v31  ;;  %v577_v38 = vsel %vm245_vm12, %v4160_v32, 0.0 }
 0x2d4   :  { %v4162_v33 = vpop.eup %4161  ;;  %v1227_v34 = vmul.f32 1.442695, %v1226_v30 }
 0x2d5   :  { %v1386_v35 = vpop.xlane.xlu1 %1385  ;;  %v738_v36 = vsel %vm245_vm12, %v4162_v33, 0.0 }
 0x2d6   :  { %4167 = vpow2.f32 %v1227_v34  ;;  %v1387_v37 = vsub.f32 %v1383_v59, %v1386_v35  ;;  %739 = vadd.xlane.f32.xlu0 %v738_v36  ;;  %578 = vadd.xlane.f32.xlu1 %v577_v38 }
 0x2d8   :  { %v4164_v39 = vpop.eup %4163  ;;  %v1388_v40 = vmul.f32 1.442695, %v1387_v37 }
 0x2d9   :  { %v904_v41 = vsel %vm245_vm12, %v4164_v39, 0.0 }
 0x2da   :  { %4169 = vpow2.f32 %v1388_v40  ;;  %905 = vadd.xlane.f32.xlu1 %v904_v41 }
 0x2dc   :  { %v4166_v42 = vpop.eup %4165 }
 0x2dd   :  { %v1068_v43 = vsel %vm245_vm12, %v4166_v42, 0.0 }
 0x2de   :  { %1069 = vadd.xlane.f32.xlu0 %v1068_v43 }
 0x2e0   :  { %v4434_v44 = vpop.eup %4167 }
 0x2e1   :  { %v1229_v45 = vsel %vm245_vm12, %v4434_v44, 0.0 }
 0x2e2   :  { %1230 = vadd.xlane.f32.xlu1 %v1229_v45 }
 0x2e4   :  { %v4438_v46 = vpop.eup %4169 }
 0x2e5   :  { %v1390_v47 = vsel %vm245_vm12, %v4438_v46, 0.0 }
 0x2e6   :  { %1391 = vadd.xlane.f32.xlu1 %v1390_v47 }
 0x2f4   :  { %257 = vrot.lane.b32.xlu0 %v4346_v12, %s4262_s19 }
 0x2f7   :  { %909 = vrot.lane.b32.xlu1 %v4350_v13, %s4262_s19 }
 0x35b   :  { %v254_v48 = vpop.xlane.xlu1 %253 }
 0x35c   :  { %4171 = vrcp.f32 %v254_v48 }
 0x35f   :  { %v418_v49 = vpop.xlane.xlu1 %417 }
 0x360   :  { %4173 = vrcp.f32 %v418_v49 }
 0x363   :  { %v740_v50 = vpop.xlane.xlu0 %739  ;;  %v579_v51 = vpop.xlane.xlu1 %578 }
 0x364   :  { %4175 = vrcp.f32 %v579_v51 }
 0x365   :  { %4177 = vrcp.f32 %v740_v50 }
 0x366   :  { %v4172_v53 = vpop.eup %4171 }
 0x367   :  { %v906_v54 = vpop.xlane.xlu1 %905  ;;  %v256_v55 = vmul.f32 %v4172_v53, %v4156_v20  ;;  %v62_v20 = vld [vmem:[%s4854_s3 + $0x18] sm:$0xff] }
 0x368   :  { %4179 = vrcp.f32 %v906_v54  ;;  %v4080_v22 = vpack.c.bf16 %v62_v20, %v61_v19  ;;  %v4500_v54 = vshrl.u32 %v32_v14, 7  ;;  %v66_v19 = vld [vmem:[%s4855_s4 + $0x18] sm:$0xff] }
 0x369   :  { %v4088_v20 = vpack.c.bf16 %v66_v19, %v65_v18 }
 0x36a   :  { %v4174_v57 = vpop.eup %4173  ;;  %4081 = vmatprep.subr.bf16.mxu0 %v4080_v22 }
 0x36b   :  { %v1070_v52 = vpop.xlane.xlu0 %1069  ;;  %v420_v12 = vmul.f32 %v4174_v57, %v4158_v28  ;;  %4083 = vmatpush3.bf16.msra.mxu0 %v4080_v22  ;;  %v68_v22 = vld [vmem:[%s4857_s6] sm:$0xff] }
 0x36c   :  { %4181 = vrcp.f32 %v1070_v52 }
 0x36e   :  { %v4176_v13 = vpop.eup %4175 }
 0x36f   :  { %v258_v56 = vpop.permute.xlu0 %257  ;;  %v1231_v58 = vpop.xlane.xlu1 %1230  ;;  %v581_v59 = vmul.f32 %v4176_v13, %v4160_v32 }
 0x370   :  { %3821 = vmatpush3.msra.mxu1 %v258_v56  ;;  %v4178_v61 = vpop.eup %4177  ;;  %4183 = vrcp.f32 %v1231_v58 }
 0x371   :  { %3823 = vmatmul.mubr.msk.f32.vlgmr.msra.gmra.mrb[4].mxu1 %vm245_vm12, %v256_v55  ;;  %3830 = vmatprep.subr.mxu1 %v4259_v8  ;;  %v742_v62 = vmul.f32 %v4178_v61, %v4162_v33  ;;  %v1472_v55 = vsub.s32 0, %v4500_v54 }
 0x372   :  { %3831 = vmatpush3.msra.mxu1 %v258_v56  ;;  %3832 = vmatprep.mubr.msk.f32.mxu1 %vm4260_vm1, %v4259_v8  ;;  %v4180_v63 = vpop.eup %4179 }
 0x373   :  { %3840 = vmatprep.subr.mxu1 %v4259_v8  ;;  %v1392_v60 = vpop.xlane.xlu1 %1391  ;;  %v908_v1 = vmul.f32 %v4180_v63, %v4164_v39 }
 0x374   :  { %4185 = vrcp.f32 %v1392_v60 }
 0x375   :  { %3833 = vmatmul.mubr.msk.f32.vlgmr.msra.gmra.mrb[6].mxu1 %vm245_vm12, %v420_v12 }
 0x376   :  { %3841 = vmatpush3.msra.mxu1 %v258_v56  ;;  %3842 = vmatprep.mubr.msk.f32.mxu1 %vm4260_vm1, %v4259_v8  ;;  %v4182_v2 = vpop.eup %4181 }
 0x377   :  { %3850 = vmatprep.subr.mxu1 %v4259_v8  ;;  %v910_v0 = vpop.permute.xlu1 %909  ;;  %v1072_v3 = vmul.f32 %v4182_v2, %v4166_v42 }
 0x379   :  { %3843 = vmatmul.mubr.msk.f32.vlgmr.msra.gmra.mrb[8].mxu1 %vm245_vm12, %v581_v59 }
 0x37a   :  { %3851 = vmatpush3.msra.mxu1 %v258_v56  ;;  %3852 = vmatprep.mubr.msk.f32.mxu1 %vm4260_vm1, %v4259_v8  ;;  %v4184_v4 = vpop.eup %4183  ;;  %v4506_v56 = vld [vmem:[%s4858_s7] sm:$0x3f] }
 0x37b   :  { %3860 = vmatprep.subr.mxu1 %v4259_v8  ;;  %v1233_v6 = vmul.f32 %v4184_v4, %v4434_v44  ;;  %v1473_v57 = vrot.slane %v4506_v56, %v1472_v55 }
 0x37d   :  { %3853 = vmatmul.mubr.msk.f32.vlgmr.msra.gmra.mrb[10].mxu1 %vm245_vm12, %v742_v62 }
 0x37e   :  { %3861 = vmatpush3.msra.mxu1 %v910_v0  ;;  %3862 = vmatprep.mubr.msk.f32.mxu1 %vm4260_vm1, %v4259_v8  ;;  %v4186_v9 = vpop.eup %4185 }
 0x37f   :  { %3870 = vmatprep.subr.mxu1 %v4259_v8  ;;  %v1394_v10 = vmul.f32 %v4186_v9, %v4438_v46 }
 0x381   :  { %3863 = vmatmul.mubr.msk.f32.vlgmr.msra.gmra.mrb[12].mxu1 %vm245_vm12, %v908_v1 }
 0x382   :  { %3871 = vmatpush3.msra.mxu1 %v910_v0  ;;  %3872 = vmatprep.mubr.msk.f32.mxu1 %vm4260_vm1, %v4259_v8 }
 0x383   :  { %3880 = vmatprep.subr.mxu1 %v4259_v8 }
 0x385   :  { %3873 = vmatmul.mubr.msk.f32.vlgmr.msra.gmra.mrb[14].mxu1 %vm245_vm12, %v1072_v3 }
 0x386   :  { %3881 = vmatpush3.msra.mxu1 %v910_v0  ;;  %3882 = vmatprep.mubr.msk.f32.mxu1 %vm4260_vm1, %v4259_v8 }
 0x387   :  { %3890 = vmatprep.subr.mxu1 %v4259_v8 }
 0x389   :  { %3883 = vmatmul.mubr.msk.f32.vlgmr.msra.gmra.mrb[16].mxu1 %vm245_vm12, %v1233_v6 }
 0x38a   :  { %3891 = vmatpush3.msra.mxu1 %v910_v0  ;;  %3892 = vmatprep.mubr.msk.f32.mxu1 %vm4260_vm1, %v4259_v8 }
 0x38d   :  { %3893 = vmatmul.mubr.msk.f32.vlgmr.msra.gmra.mrb[18].mxu1 %vm245_vm12, %v1394_v10  ;;  %v63_v10 = vld [vmem:[%s4855_s4] sm:$0xff] }
 0x38e   :  { %v4084_v15 = vpack.c.bf16 %v64_v11, %v63_v10 }
 0x390   :  { %4085 = vmatprep.subr.bf16.mxu1 %v4084_v15 }
 0x391   :  { %4087 = vmatpush3.bf16.msra.mxu1 %v4084_v15 }
 0x392   :  { %4089 = vmatprep.subr.bf16.mxu1 %v4088_v20 }
 0x395   :  { %4091 = vmatpush3.bf16.msra.mxu1 %v4088_v20 }
 0x444   :  { %v329_v24 = vpop.f32.mrb[4].mxu1 }
 0x445   :  { %v3824_v25 = vpop.f32.mrb[5].mxu1  ;;  %v333_v27 = vmul.f32 %v4356_v16, %v329_v24  ;;  %v69_v24 = vld [vmem:[%s4857_s6 + $0x8] sm:$0xff] }
 0x446   :  { %v70_v25 = vld [vmem:[%s4857_s6 + $0x10] sm:$0xff] }
 0x448   :  { %v490_v26 = vpop.f32.mrb[6].mxu1 }
 0x449   :  { %v494_v28 = vmul.f32 %v4359_v17, %v490_v26  ;;  %v3834_v29 = vpop.f32.mrb[7].mxu1  ;;  %v4092_v26 = vpack.c.bf16 %v69_v24, %v68_v22  ;;  %v3627_v24 = vld [vmem:[%s4852_s1 + $0x20] sm:$0xff] }
 0x44a   :  { %v72_v29 = vld [vmem:[%s4857_s6 + $0x20] sm:$0xff] }
 0x44b   :  { %v495_v30 = vadd.f32 %v494_v28, %v333_v27  ;;  %v71_v27 = vld [vmem:[%s4857_s6 + $0x18] sm:$0xff]  ;;  %4093 = vmatprep.subr.bf16.mxu0 %v4092_v26 }
 0x44c   :  { %v651_v31 = vpop.f32.mrb[8].mxu1  ;;  %v4096_v28 = vpack.c.bf16 %v71_v27, %v70_v25  ;;  %v3628_v25 = vld [vmem:[%s4852_s1 + $0x28] sm:$0xff]  ;;  %v3629_v27 = vld [vmem:[%s4852_s1 + $0x30] sm:$0xff] }
 0x44d   :  { %v655_v32 = vmul.f32 %v4370_v21, %v651_v31  ;;  %v3844_v33 = vpop.f32.mrb[9].mxu1 }
 0x44f   :  { %v656_v34 = vadd.f32 %v655_v32, %v495_v30  ;;  %v73_v30 = vld [vmem:[%s4857_s6 + $0x28] sm:$0xff] }
 0x450   :  { %v812_v35 = vpop.f32.mrb[10].mxu1  ;;  %v4100_v31 = vpack.c.bf16 %v73_v30, %v72_v29 }
 0x451   :  { %v816_v36 = vmul.f32 %v4383_v23, %v812_v35  ;;  %v3854_v37 = vpop.f32.mrb[11].mxu1 }
 0x453   :  { %v817_v38 = vadd.f32 %v816_v36, %v656_v34 }
 0x454   :  { %v981_v39 = vpop.f32.mrb[12].mxu1 }
 0x455   :  { %v3864_v40 = vpop.f32.mrb[13].mxu1  ;;  %3903 = vmatprep.mubr.msk.f32.mxu0 %vm83_vm0, %v817_v38  ;;  %v985_v42 = vmul.f32 %v4356_v16, %v981_v39  ;;  %v1584_v38 = vsub.s32 2, %v4500_v54  ;;  %v1590_v39 = vsub.s32 3, %v4500_v54 }
 0x457   :  { %v1585_v40 = vrot.slane %v4506_v56, %v1584_v38 }
 0x458   :  { %v1142_v41 = vpop.f32.mrb[14].mxu1 }
 0x459   :  { %v1146_v43 = vmul.f32 %v4359_v17, %v1142_v41  ;;  %v3874_v44 = vpop.f32.mrb[15].mxu1 }
 0x45b   :  { %v1147_v45 = vadd.f32 %v1146_v43, %v985_v42  ;;  %v1591_v43 = vrot.slane %v4506_v56, %v1590_v39 }
 0x45c   :  { %v1303_v46 = vpop.f32.mrb[16].mxu1 }
 0x45d   :  { %v1307_v47 = vmul.f32 %v4370_v21, %v1303_v46  ;;  %v3884_v48 = vpop.f32.mrb[17].mxu1 }
 0x45f   :  { %v1308_v49 = vadd.f32 %v1307_v47, %v1147_v45 }
 0x460   :  { %v1464_v50 = vpop.f32.mrb[18].mxu1 }
 0x461   :  { %v1468_v51 = vmul.f32 %v4383_v23, %v1464_v50  ;;  %v3894_v52 = vpop.f32.mrb[19].mxu1 }
 0x462   :  { %v74_v52 = vld [vmem:[%s4857_s6 + $0x30] sm:$0xff] }
 0x463   :  { %v1469_v53 = vadd.f32 %v1468_v51, %v1308_v49 }
 0x465   :  { %3904 = vmatmul.mubr.msk.f32.vlgmr.msra.gmra.mrb[14].mxu0 %vm83_vm0, %v1469_v53  ;;  %v75_v53 = vld [vmem:[%s4857_s6 + $0x38] sm:$0xff] }
 0x466   :  { %4095 = vmatpush3.bf16.msra.mxu0 %v4092_v26  ;;  %v4108_v26 = vpack.c.bf16 %v3628_v25, %v3627_v24 }
 0x467   :  { %4097 = vmatprep.subr.bf16.mxu0 %v4096_v28 }
 0x468   :  { %4109 = vmatprep.subr.bf16.mxu1 %v4108_v26 }
 0x46a   :  { %4099 = vmatpush3.bf16.msra.mxu0 %v4096_v28  ;;  %v3630_v28 = vld [vmem:[%s4852_s1 + $0x38] sm:$0xff] }
 0x46b   :  { %4101 = vmatprep.subr.bf16.mxu0 %v4100_v31  ;;  %v4112_v29 = vpack.c.bf16 %v3630_v28, %v3629_v27 }
 0x46e   :  { %4103 = vmatpush3.bf16.msra.mxu0 %v4100_v31 }
 0x538   :  { %v3905_v58 = vpop.f32.mrb[14].mxu0 }
 0x539   :  { %v1552_v12 = vadd.f32 %v3905_v58, %v1473_v57  ;;  %v1546_v13 = vpop.f32.mrb[15].mxu0 }
 0x53a   :  { %v1547_v59 = vadd.f32 %v1546_v13, %v1473_v57 }
 0x53b   :  { %v1558_v60 = vsel %vm83_vm0, %v1552_v12, 0.0 }
 0x53c   :  { %1559 = vadd.xlane.f32.xlu1 %v1558_v60  ;;  %v1555_v14 = vsel %vm83_vm0, %v1547_v59, 0.0 }
 0x53d   :  { %1556 = vadd.xlane.f32.xlu0 %v1555_v14  ;;  %v1687_v14 = vsub.s32 1, %v4500_v54 }
 0x5c9   :  { %v1560_v61 = vpop.xlane.xlu1 %1559 }
 0x5ca   :  { %v1563_v62 = vmul.f32 0.03125, %v1560_v61  ;;  %v1557_v63 = vpop.xlane.xlu0 %1556  ;;  %v1688_v61 = vrot.slane %v4506_v56, %v1687_v14 }
 0x5cb   :  { %v1562_v0 = vmul.f32 0.03125, %v1557_v63 }
 0x5cc   :  { %v1565_v1 = vsub.f32 %v1552_v12, %v1563_v62 }
 0x5cd   :  { %v1564_v2 = vsub.f32 %v1547_v59, %v1562_v0 }
 0x5ce   :  { %v1567_v6 = vmul.f32 %v1565_v1, %v1565_v1 }
 0x5cf   :  { %v1566_v3 = vmul.f32 %v1564_v2, %v1564_v2 }
 0x5d0   :  { %v1571_v9 = vsel %vm83_vm0, %v1567_v6, 0.0 }
 0x5d1   :  { %v1568_v4 = vsel %vm83_vm0, %v1566_v3, 0.0 }
 0x5d2   :  { %1569 = vadd.xlane.f32.xlu0 %v1568_v4 }
 0x5d6   :  { %1572 = vadd.xlane.f32.xlu0 %v1571_v9 }
 0x65f   :  { %v1570_v32 = vpop.xlane.xlu0 %1569 }
 0x660   :  { %v1574_v33 = vmul.f32 0.03125, %v1570_v32 }
 0x662   :  { %v1576_v34 = vadd.f32 1e-05, %v1574_v33 }
 0x663   :  { %v1573_v35 = vpop.xlane.xlu0 %1572 }
 0x664   :  { %4187 = vrsqrt.f32 %v1576_v34  ;;  %v1575_v36 = vmul.f32 0.03125, %v1573_v35 }
 0x666   :  { %v1577_v37 = vadd.f32 1e-05, %v1575_v36  ;;  %v1799_v36 = vsub.s32 4, %v4500_v54 }
 0x668   :  { %4189 = vrsqrt.f32 %v1577_v37  ;;  %v1805_v37 = vsub.s32 5, %v4500_v54 }
 0x66e   :  { %v4188_v41 = vpop.eup %4187 }
 0x66f   :  { %v1580_v42 = vmul.f32 %v4188_v41, %v1564_v2 }
 0x671   :  { %v1586_v44 = vmul.f32 %v1585_v40, %v1580_v42 }
 0x672   :  { %v4190_v45 = vpop.eup %4189 }
 0x673   :  { %v1581_v46 = vmul.f32 %v4190_v45, %v1565_v1  ;;  %v1592_v47 = vadd.f32 %v1591_v43, %v1586_v44  ;;  %v1806_v44 = vrot.slane %v4506_v56, %v1805_v37 }
 0x675   :  { %v1587_v48 = vmul.f32 %v1585_v40, %v1581_v46  ;;  %v4554_v49 = vadd.f32 %v1592_v47, %v4326_v5  ;;  %v4104_v5 = vpack.c.bf16 %v75_v53, %v74_v52  ;;  %v1800_v40 = vrot.slane %v4506_v56, %v1799_v36  ;;  %v3650_v56 = vld [vmem:[%s4853_s2 + $0x1] ss:$0 sm:$0xff] }
 0x677   :  { %v1593_v50 = vadd.f32 %v1591_v43, %v1587_v48  ;;  %3914 = vmatprep.mubr.msk.f32.mxu1 %vm83_vm0, %v4554_v49  ;;  %4105 = vmatprep.subr.bf16.mxu0 %v4104_v5 }
 0x678   :  { %4107 = vmatpush3.bf16.msra.mxu0 %v4104_v5 }
 0x679   :  { %v4559_v51 = vadd.f32 %v1593_v50, %v4333_v7  ;;  %3957 = vmatprep.subr.mxu0 %v4259_v8  ;;  %v3622_v7 = vld [vmem:[%s4856_s5] ss:$0 sm:$0xff] }
 0x67b   :  { %3915 = vmatmul.mubr.msk.f32.vlgmr.msra.gmra.mrb[20].mxu1 %vm83_vm0, %v4559_v51 }
 0x67c   :  { %4111 = vmatpush3.bf16.msra.mxu1 %v4108_v26 }
 0x67d   :  { %4113 = vmatprep.subr.bf16.mxu1 %v4112_v29 }
 0x680   :  { %4115 = vmatpush3.bf16.msra.mxu1 %v4112_v29 }
 0x681   :  { %3947 = vmatprep.subr.mxu1 %v4259_v8 }
 0x74e   :  { %v3916_v57 = vpop.f32.mrb[20].mxu1 }
 0x74f   :  { %v1680_v58 = vadd.f32 %v3916_v57, %v3622_v7  ;;  %v1674_v12 = vpop.f32.mrb[21].mxu1 }
 0x750   :  { %v1675_v13 = vadd.f32 %v3622_v7, %v1674_v12 }
 0x751   :  { %v1684_v60 = vmax.f32 %v1680_v58, 0.0 }
 0x752   :  { %v1683_v59 = vmax.f32 %v1675_v13, 0.0 }
 0x754   :  { %3933 = vmatprep.mubr.msk.f32.mxu0 %vm1689_vm13, %v1683_v59 }
 0x755   :  { %3934 = vmatmul.mubr.msk.f32.vlgmr.msra.gmra.mrb[16].mxu0 %vm1689_vm13, %v1684_v60 }
 0x756   :  { %3959 = vmatprep.mubr.msk.f32.mxu0 %vm4260_vm1, %v4259_v8 }
 0x828   :  { %v3935_v62 = vpop.f32.mrb[16].mxu0 }
 0x829   :  { %v1768_v63 = vadd.f32 %v3935_v62, %v1688_v61  ;;  %v1762_v0 = vpop.f32.mrb[17].mxu0 }
 0x82a   :  { %v1763_v1 = vadd.f32 %v1762_v0, %v1688_v61 }
 0x82b   :  { %v1774_v2 = vsel %vm83_vm0, %v1768_v63, 0.0 }
 0x82c   :  { %1775 = vadd.xlane.f32.xlu0 %v1774_v2  ;;  %v1771_v3 = vsel %vm83_vm0, %v1763_v1, 0.0 }
 0x82d   :  { %1772 = vadd.xlane.f32.xlu1 %v1771_v3 }
 0x8b9   :  { %v1776_v4 = vpop.xlane.xlu0 %1775 }
 0x8ba   :  { %v1778_v6 = vmul.f32 0.03125, %v1776_v4  ;;  %v1773_v9 = vpop.xlane.xlu1 %1772 }
 0x8bb   :  { %v1777_v10 = vmul.f32 0.03125, %v1773_v9 }
 0x8bc   :  { %v1780_v11 = vsub.f32 %v1768_v63, %v1778_v6 }
 0x8bd   :  { %v1779_v15 = vsub.f32 %v1763_v1, %v1777_v10 }
 0x8be   :  { %v1782_v18 = vmul.f32 %v1780_v11, %v1780_v11 }
 0x8bf   :  { %v1781_v19 = vmul.f32 %v1779_v15, %v1779_v15 }
 0x8c0   :  { %v1786_v20 = vsel %vm83_vm0, %v1782_v18, 0.0 }
 0x8c1   :  { %1787 = vadd.xlane.f32.xlu0 %v1786_v20  ;;  %v1783_v22 = vsel %vm83_vm0, %v1781_v19, 0.0 }
 0x8c2   :  { %1784 = vadd.xlane.f32.xlu1 %v1783_v22 }
 0x94e   :  { %v1788_v30 = vpop.xlane.xlu0 %1787 }
 0x94f   :  { %v1790_v31 = vmul.f32 0.03125, %v1788_v30  ;;  %v1785_v32 = vpop.xlane.xlu1 %1784 }
 0x950   :  { %v1789_v33 = vmul.f32 0.03125, %v1785_v32 }
 0x951   :  { %v1792_v34 = vadd.f32 1e-05, %v1790_v31 }
 0x952   :  { %v1791_v35 = vadd.f32 1e-05, %v1789_v33 }
 0x953   :  { %4191 = vrsqrt.f32 %v1792_v34 }
 0x954   :  { %4193 = vrsqrt.f32 %v1791_v35 }
 0x95d   :  { %v4192_v41 = vpop.eup %4191 }
 0x95e   :  { %v4194_v42 = vpop.eup %4193  ;;  %v1796_v43 = vmul.f32 %v4192_v41, %v1780_v11 }
 0x95f   :  { %v1795_v45 = vmul.f32 %v4194_v42, %v1779_v15 }
 0x960   :  { %v1802_v46 = vmul.f32 %v1800_v40, %v1796_v43 }
 0x961   :  { %v1801_v47 = vmul.f32 %v1800_v40, %v1795_v45 }
 0x962   :  { %v1808_v48 = vadd.f32 %v1806_v44, %v1802_v46 }
 0x963   :  { %v1807_v50 = vadd.f32 %v1806_v44, %v1801_v47 }
 0x964   :  { %v4610_v53 = vadd.f32 %v1808_v48, %v4559_v51 }
 0x965   :  { %v4607_v52 = vadd.f32 %v1807_v50, %v4554_v49 }
 0x967   :  { %3944 = vmatprep.mubr.msk.f32.mxu1 %vm83_vm0, %v4607_v52 }
 0x968   :  { %3945 = vmatmul.mubr.msk.f32.vlgmr.msra.gmra.mrb[22].mxu1 %vm83_vm0, %v4610_v53 }
 0x969   :  { %3949 = vmatprep.mubr.msk.f32.mxu1 %vm4260_vm1, %v4259_v8 }
 0xa3b   :  { %v3946_v5 = vpop.f32.mrb[22].mxu1 }
 0xa3c   :  { %v4621_v7 = vadd.f32 %v3946_v5, %v3650_v56  ;;  %v1919_v49 = vpop.f32.mrb[23].mxu1 }
 0xa3d   :  { %v4623_v57 = vadd.f32 %v3650_v56, %v1919_v49 }
 0xa3e   :  { %2582 = vrot.lane.b32.xlu0 %v4621_v7, %s4261_s0  ;;  %v2580_v61 = vmul.f32 %v4356_v16, %v4621_v7  ;;  %v2749_v62 = vmul.f32 %v4359_v17, %v4621_v7  ;;  %v2910_v63 = vmul.f32 %v4370_v21, %v4621_v7  ;;  %v3071_v0 = vmul.f32 %v4383_v23, %v4621_v7 }
 0xa3f   :  { %1930 = vrot.lane.b32.xlu1 %v4623_v57, %s4261_s0  ;;  %v1928_v58 = vmul.f32 %v4356_v16, %v4623_v57  ;;  %v2097_v12 = vmul.f32 %v4359_v17, %v4623_v57  ;;  %v2258_v13 = vmul.f32 %v4370_v21, %v4623_v57  ;;  %v2419_v59 = vmul.f32 %v4383_v23, %v4623_v57 }
 0xab0   :  { %v2583_v60 = vpop.permute.xlu0 %2582 }
 0xab1   :  { %v1931_v51 = vpop.permute.xlu1 %1930 }
 0xab2   :  { %3948 = vmatpush3.xpose.msk.msra.mxu1 %vm83_vm0, %v1931_v51  ;;  %3958 = vmatpush3.xpose.msk.msra.mxu0 %vm83_vm0, %v1931_v51 }
 0xab3   :  { %3967 = vmatprep.subr.mxu0 %v4259_v8  ;;  %3952 = vmatprep.subr.mxu1 %v4259_v8 }
 0xab5   :  { %3950 = vmatmul.mubr.msk.f32.vlgmr.msra.gmra.mrb[24].mxu1 %vm83_vm0, %v1928_v58  ;;  %3960 = vmatmul.mubr.msk.f32.vlgmr.msra.gmra.mrb[18].mxu0 %vm83_vm0, %v2097_v12 }
 0xab6   :  { %3968 = vmatpush3.xpose.msk.msra.mxu0 %vm83_vm0, %v1931_v51  ;;  %3969 = vmatprep.mubr.msk.f32.mxu0 %vm4260_vm1, %v4259_v8 }
 0xab7   :  { %3977 = vmatprep.subr.mxu0 %v4259_v8  ;;  %3954 = vmatprep.mubr.msk.f32.mxu1 %vm4260_vm1, %v4259_v8 }
 0xab9   :  { %3970 = vmatmul.mubr.msk.f32.vlgmr.msra.gmra.mrb[20].mxu0 %vm83_vm0, %v2258_v13 }
 0xaba   :  { %3978 = vmatpush3.xpose.msk.msra.mxu0 %vm83_vm0, %v1931_v51  ;;  %3979 = vmatprep.mubr.msk.f32.mxu0 %vm4260_vm1, %v4259_v8 }
 0xabb   :  { %3987 = vmatprep.subr.mxu0 %v4259_v8 }
 0xabd   :  { %3980 = vmatmul.mubr.msk.f32.vlgmr.msra.gmra.mrb[22].mxu0 %vm83_vm0, %v2419_v59 }
 0xabe   :  { %3988 = vmatpush3.xpose.msk.msra.mxu0 %vm83_vm0, %v2583_v60  ;;  %3989 = vmatprep.mubr.msk.f32.mxu0 %vm4260_vm1, %v4259_v8 }
 0xabf   :  { %3997 = vmatprep.subr.mxu0 %v4259_v8 }
 0xac1   :  { %3990 = vmatmul.mubr.msk.f32.vlgmr.msra.gmra.mrb[24].mxu0 %vm83_vm0, %v2580_v61 }
 0xac2   :  { %3998 = vmatpush3.xpose.msk.msra.mxu0 %vm83_vm0, %v2583_v60  ;;  %3999 = vmatprep.mubr.msk.f32.mxu0 %vm4260_vm1, %v4259_v8 }
 0xac3   :  { %4007 = vmatprep.subr.mxu0 %v4259_v8 }
 0xac5   :  { %4000 = vmatmul.mubr.msk.f32.vlgmr.msra.gmra.mrb[26].mxu0 %vm83_vm0, %v2749_v62 }
 0xac6   :  { %4008 = vmatpush3.xpose.msk.msra.mxu0 %vm83_vm0, %v2583_v60  ;;  %4009 = vmatprep.mubr.msk.f32.mxu0 %vm4260_vm1, %v4259_v8 }
 0xac7   :  { %4017 = vmatprep.subr.mxu0 %v4259_v8 }
 0xac9   :  { %4010 = vmatmul.mubr.msk.f32.vlgmr.msra.gmra.mrb[28].mxu0 %vm83_vm0, %v2910_v63 }
 0xaca   :  { %4018 = vmatpush3.xpose.msk.msra.mxu0 %vm83_vm0, %v2583_v60  ;;  %4019 = vmatprep.mubr.msk.f32.mxu0 %vm4260_vm1, %v4259_v8 }
 0xacd   :  { %4020 = vmatmul.mubr.msk.f32.vlgmr.msra.gmra.mrb[30].mxu0 %vm83_vm0, %v3071_v0 }
 0xb88   :  { %v2003_v1 = vpop.f32.mrb[24].mxu1  ;;  %v2167_v2 = vpop.f32.mrb[18].mxu0 }
 0xb89   :  { %v2007_v3 = vmul.f32 0.35355338, %v2003_v1  ;;  %v2171_v4 = vmul.f32 0.35355338, %v2167_v2  ;;  %v3951_v6 = vpop.f32.mrb[25].mxu1  ;;  %v3961_v9 = vpop.f32.mrb[19].mxu0 }
 0xb8b   :  { %v2172_v10 = vsel %vm245_vm12, %v2171_v4, -inf  ;;  %v2008_v11 = vsel %vm245_vm12, %v2007_v3, -inf }
 0xb8c   :  { %2173 = vmax.xlane.f32.xlu0 %v2172_v10  ;;  %v2328_v15 = vpop.f32.mrb[20].mxu0  ;;  %2009 = vmax.xlane.f32.xlu1 %v2008_v11 }
 0xb8d   :  { %v2332_v18 = vmul.f32 0.35355338, %v2328_v15  ;;  %v3971_v19 = vpop.f32.mrb[21].mxu0 }
 0xb8f   :  { %v2333_v20 = vsel %vm245_vm12, %v2332_v18, -inf }
 0xb90   :  { %v2489_v22 = vpop.f32.mrb[22].mxu0  ;;  %2334 = vmax.xlane.f32.xlu1 %v2333_v20 }
 0xb91   :  { %v2493_v24 = vmul.f32 0.35355338, %v2489_v22  ;;  %v3981_v25 = vpop.f32.mrb[23].mxu0 }
 0xb93   :  { %v2494_v26 = vsel %vm245_vm12, %v2493_v24, -inf }
 0xb94   :  { %2495 = vmax.xlane.f32.xlu0 %v2494_v26  ;;  %v2655_v27 = vpop.f32.mrb[24].mxu0 }
 0xb95   :  { %v2659_v28 = vmul.f32 0.35355338, %v2655_v27  ;;  %v3991_v29 = vpop.f32.mrb[25].mxu0 }
 0xb97   :  { %v2660_v30 = vsel %vm245_vm12, %v2659_v28, -inf }
 0xb98   :  { %v2819_v31 = vpop.f32.mrb[26].mxu0  ;;  %2661 = vmax.xlane.f32.xlu1 %v2660_v30 }
 0xb99   :  { %v2823_v32 = vmul.f32 0.35355338, %v2819_v31  ;;  %v4001_v33 = vpop.f32.mrb[27].mxu0 }
 0xb9b   :  { %v2824_v34 = vsel %vm245_vm12, %v2823_v32, -inf }
 0xb9c   :  { %2825 = vmax.xlane.f32.xlu0 %v2824_v34  ;;  %v2980_v35 = vpop.f32.mrb[28].mxu0 }
 0xb9d   :  { %v2984_v40 = vmul.f32 0.35355338, %v2980_v35  ;;  %v4011_v41 = vpop.f32.mrb[29].mxu0 }
 0xb9f   :  { %v2985_v42 = vsel %vm245_vm12, %v2984_v40, -inf }
 0xba0   :  { %v3141_v43 = vpop.f32.mrb[30].mxu0  ;;  %2986 = vmax.xlane.f32.xlu1 %v2985_v42 }
 0xba1   :  { %v3145_v44 = vmul.f32 0.35355338, %v3141_v43  ;;  %v4021_v45 = vpop.f32.mrb[31].mxu0 }
 0xba3   :  { %v3146_v46 = vsel %vm245_vm12, %v3145_v44, -inf }
 0xba4   :  { %3147 = vmax.xlane.f32.xlu0 %v3146_v46 }
 0xc19   :  { %v2174_v47 = vpop.xlane.xlu0 %2173  ;;  %v2010_v48 = vpop.xlane.xlu1 %2009 }
 0xc1a   :  { %v2175_v50 = vsub.f32 %v2171_v4, %v2174_v47  ;;  %v2011_v56 = vsub.f32 %v2007_v3, %v2010_v48 }
 0xc1c   :  { %v2176_v5 = vmul.f32 1.442695, %v2175_v50  ;;  %v2012_v49 = vmul.f32 1.442695, %v2011_v56 }
 0xc1d   :  { %v2335_v51 = vpop.xlane.xlu1 %2334 }
 0xc1e   :  { %4195 = vpow2.f32 %v2176_v5  ;;  %v2336_v58 = vsub.f32 %v2332_v18, %v2335_v51 }
 0xc1f   :  { %4197 = vpow2.f32 %v2012_v49 }
 0xc20   :  { %v2337_v12 = vmul.f32 1.442695, %v2336_v58 }
 0xc21   :  { %v2496_v13 = vpop.xlane.xlu0 %2495 }
 0xc22   :  { %4199 = vpow2.f32 %v2337_v12  ;;  %v2497_v59 = vsub.f32 %v2493_v24, %v2496_v13 }
 0xc24   :  { %v2498_v60 = vmul.f32 1.442695, %v2497_v59 }
 0xc25   :  { %v2662_v61 = vpop.xlane.xlu1 %2661 }
 0xc26   :  { %4201 = vpow2.f32 %v2498_v60  ;;  %v2663_v62 = vsub.f32 %v2659_v28, %v2662_v61 }
 0xc28   :  { %v4196_v63 = vpop.eup %4195  ;;  %v2664_v0 = vmul.f32 1.442695, %v2663_v62 }
 0xc29   :  { %v4198_v1 = vpop.eup %4197  ;;  %v2826_v2 = vpop.xlane.xlu0 %2825  ;;  %v2178_v3 = vsel %vm245_vm12, %v4196_v63, 0.0 }
 0xc2a   :  { %4203 = vpow2.f32 %v2664_v0  ;;  %v2827_v4 = vsub.f32 %v2823_v32, %v2826_v2  ;;  %2179 = vadd.xlane.f32.xlu0 %v2178_v3  ;;  %v2014_v6 = vsel %vm245_vm12, %v4198_v1, 0.0  ;;  %v3633_v2 = vld [vmem:[%s4854_s3 + $0x28] sm:$0xff] }
 0xc2b   :  { %2015 = vadd.xlane.f32.xlu1 %v2014_v6 }
 0xc2c   :  { %v4200_v9 = vpop.eup %4199  ;;  %v2828_v10 = vmul.f32 1.442695, %v2827_v4  ;;  %v3634_v4 = vld [vmem:[%s4854_s3 + $0x30] sm:$0xff] }
 0xc2d   :  { %v2987_v11 = vpop.xlane.xlu1 %2986  ;;  %v2339_v15 = vsel %vm245_vm12, %v4200_v9, 0.0 }
 0xc2e   :  { %4205 = vpow2.f32 %v2828_v10  ;;  %v2988_v18 = vsub.f32 %v2984_v40, %v2987_v11 }
 0xc2f   :  { %2340 = vadd.xlane.f32.xlu1 %v2339_v15 }
 0xc30   :  { %v4202_v19 = vpop.eup %4201  ;;  %v2989_v20 = vmul.f32 1.442695, %v2988_v18 }
 0xc31   :  { %v3148_v22 = vpop.xlane.xlu0 %3147  ;;  %v2500_v24 = vsel %vm245_vm12, %v4202_v19, 0.0 }
 0xc32   :  { %4207 = vpow2.f32 %v2989_v20  ;;  %v3149_v25 = vsub.f32 %v3145_v44, %v3148_v22  ;;  %2501 = vadd.xlane.f32.xlu0 %v2500_v24 }
 0xc34   :  { %v4204_v26 = vpop.eup %4203  ;;  %v3150_v27 = vmul.f32 1.442695, %v3149_v25 }
 0xc35   :  { %v2666_v28 = vsel %vm245_vm12, %v4204_v26, 0.0 }
 0xc36   :  { %4209 = vpow2.f32 %v3150_v27  ;;  %2667 = vadd.xlane.f32.xlu1 %v2666_v28 }
 0xc38   :  { %v4206_v29 = vpop.eup %4205 }
 0xc39   :  { %v2830_v30 = vsel %vm245_vm12, %v4206_v29, 0.0 }
 0xc3a   :  { %2831 = vadd.xlane.f32.xlu0 %v2830_v30 }
 0xc3c   :  { %v4696_v31 = vpop.eup %4207 }
 0xc3d   :  { %v2991_v32 = vsel %vm245_vm12, %v4696_v31, 0.0 }
 0xc3e   :  { %2992 = vadd.xlane.f32.xlu1 %v2991_v32 }
 0xc40   :  { %v4700_v33 = vpop.eup %4209 }
 0xc41   :  { %v3152_v34 = vsel %vm245_vm12, %v4700_v33, 0.0 }
 0xc42   :  { %3153 = vadd.xlane.f32.xlu1 %v3152_v34 }
 0xc50   :  { %2019 = vrot.lane.b32.xlu0 %v4623_v57, %s4262_s19 }
 0xc53   :  { %2671 = vrot.lane.b32.xlu1 %v4621_v7, %s4262_s19 }
 0xcb7   :  { %v2180_v40 = vpop.xlane.xlu0 %2179 }
 0xcb8   :  { %v2016_v35 = vpop.xlane.xlu1 %2015 }
 0xcb9   :  { %4211 = vrcp.f32 %v2016_v35 }
 0xcba   :  { %4213 = vrcp.f32 %v2180_v40 }
 0xcbc   :  { %v2341_v41 = vpop.xlane.xlu1 %2340 }
 0xcbd   :  { %4215 = vrcp.f32 %v2341_v41 }
 0xcbf   :  { %v2502_v42 = vpop.xlane.xlu0 %2501 }
 0xcc0   :  { %4217 = vrcp.f32 %v2502_v42 }
 0xcc3   :  { %v4212_v44 = vpop.eup %4211  ;;  %v2668_v45 = vpop.xlane.xlu1 %2667 }
 0xcc4   :  { %v2018_v46 = vmul.f32 %v4212_v44, %v4198_v1  ;;  %v4214_v48 = vpop.eup %4213  ;;  %4219 = vrcp.f32 %v2668_v45  ;;  %v3632_v1 = vld [vmem:[%s4854_s3 + $0x20] sm:$0xff] }
 0xcc5   :  { %v2182_v7 = vmul.f32 %v4214_v48, %v4196_v63  ;;  %v4116_v3 = vpack.c.bf16 %v3633_v2, %v3632_v1  ;;  %v3638_v2 = vld [vmem:[%s4855_s4 + $0x30] sm:$0xff] }
 0xcc7   :  { %v2832_v43 = vpop.xlane.xlu0 %2831  ;;  %v4216_v57 = vpop.eup %4215  ;;  %4117 = vmatprep.subr.bf16.mxu0 %v4116_v3 }
 0xcc8   :  { %4221 = vrcp.f32 %v2832_v43  ;;  %v2343_v56 = vmul.f32 %v4216_v57, %v4200_v9  ;;  %4119 = vmatpush3.bf16.msra.mxu0 %v4116_v3  ;;  %v3639_v3 = vld [vmem:[%s4855_s4 + $0x38] sm:$0xff] }
 0xcca   :  { %v4218_v49 = vpop.eup %4217 }
 0xccb   :  { %v2020_v47 = vpop.permute.xlu0 %2019  ;;  %v2993_v50 = vpop.xlane.xlu1 %2992  ;;  %v2504_v51 = vmul.f32 %v4218_v49, %v4202_v19 }
 0xccc   :  { %3953 = vmatpush3.msra.mxu1 %v2020_v47  ;;  %4223 = vrcp.f32 %v2993_v50 }
 0xccd   :  { %3955 = vmatmul.mubr.msk.f32.vlgmr.msra.gmra.mrb[26].mxu1 %vm245_vm12, %v2018_v46  ;;  %3962 = vmatprep.subr.mxu1 %v4259_v8 }
 0xcce   :  { %3963 = vmatpush3.msra.mxu1 %v2020_v47  ;;  %3964 = vmatprep.mubr.msk.f32.mxu1 %vm4260_vm1, %v4259_v8  ;;  %v4220_v58 = vpop.eup %4219 }
 0xccf   :  { %3972 = vmatprep.subr.mxu1 %v4259_v8  ;;  %v3154_v5 = vpop.xlane.xlu1 %3153  ;;  %v2670_v13 = vmul.f32 %v4220_v58, %v4204_v26 }
 0xcd0   :  { %4225 = vrcp.f32 %v3154_v5 }
 0xcd1   :  { %3965 = vmatmul.mubr.msk.f32.vlgmr.msra.gmra.mrb[28].mxu1 %vm245_vm12, %v2182_v7 }
 0xcd2   :  { %3973 = vmatpush3.msra.mxu1 %v2020_v47  ;;  %3974 = vmatprep.mubr.msk.f32.mxu1 %vm4260_vm1, %v4259_v8  ;;  %v4222_v59 = vpop.eup %4221 }
 0xcd3   :  { %3982 = vmatprep.subr.mxu1 %v4259_v8  ;;  %v2672_v12 = vpop.permute.xlu1 %2671  ;;  %v2834_v60 = vmul.f32 %v4222_v59, %v4206_v29 }
 0xcd5   :  { %3975 = vmatmul.mubr.msk.f32.vlgmr.msra.gmra.mrb[30].mxu1 %vm245_vm12, %v2343_v56 }
 0xcd6   :  { %3983 = vmatpush3.msra.mxu1 %v2020_v47  ;;  %3984 = vmatprep.mubr.msk.f32.mxu1 %vm4260_vm1, %v4259_v8  ;;  %v4224_v61 = vpop.eup %4223 }
 0xcd7   :  { %3992 = vmatprep.subr.mxu1 %v4259_v8  ;;  %v2995_v62 = vmul.f32 %v4224_v61, %v4696_v31 }
 0xcd9   :  { %3985 = vmatmul.mubr.msk.f32.vlgmr.msra.gmra.mrb[32].mxu1 %vm245_vm12, %v2504_v51 }
 0xcda   :  { %3993 = vmatpush3.msra.mxu1 %v2672_v12  ;;  %3994 = vmatprep.mubr.msk.f32.mxu1 %vm4260_vm1, %v4259_v8  ;;  %v4226_v63 = vpop.eup %4225 }
 0xcdb   :  { %4002 = vmatprep.subr.mxu1 %v4259_v8  ;;  %v3156_v0 = vmul.f32 %v4226_v63, %v4700_v33  ;;  %v3636_v63 = vld [vmem:[%s4855_s4 + $0x20] sm:$0xff] }
 0xcdd   :  { %3995 = vmatmul.mubr.msk.f32.vlgmr.msra.gmra.mrb[34].mxu1 %vm245_vm12, %v2670_v13 }
 0xcde   :  { %4003 = vmatpush3.msra.mxu1 %v2672_v12  ;;  %4004 = vmatprep.mubr.msk.f32.mxu1 %vm4260_vm1, %v4259_v8 }
 0xcdf   :  { %4012 = vmatprep.subr.mxu1 %v4259_v8 }
 0xce1   :  { %4005 = vmatmul.mubr.msk.f32.vlgmr.msra.gmra.mrb[36].mxu1 %vm245_vm12, %v2834_v60 }
 0xce2   :  { %4013 = vmatpush3.msra.mxu1 %v2672_v12  ;;  %4014 = vmatprep.mubr.msk.f32.mxu1 %vm4260_vm1, %v4259_v8 }
 0xce3   :  { %4022 = vmatprep.subr.mxu1 %v4259_v8 }
 0xce5   :  { %4015 = vmatmul.mubr.msk.f32.vlgmr.msra.gmra.mrb[38].mxu1 %vm245_vm12, %v2995_v62 }
 0xce6   :  { %4023 = vmatpush3.msra.mxu1 %v2672_v12  ;;  %4024 = vmatprep.mubr.msk.f32.mxu1 %vm4260_vm1, %v4259_v8  ;;  %v3635_v8 = vld [vmem:[%s4854_s3 + $0x38] sm:$0xff] }
 0xce7   :  { %v4120_v6 = vpack.c.bf16 %v3635_v8, %v3634_v4  ;;  %v4128_v4 = vpack.c.bf16 %v3639_v3, %v3638_v2  ;;  %v3641_v8 = vld [vmem:[%s4857_s6 + $0x40] sm:$0xff] }
 0xce9   :  { %4025 = vmatmul.mubr.msk.f32.vlgmr.msra.gmra.mrb[40].mxu1 %vm245_vm12, %v3156_v0  ;;  %4121 = vmatprep.subr.bf16.mxu0 %v4120_v6  ;;  %v3637_v0 = vld [vmem:[%s4855_s4 + $0x28] sm:$0xff] }
 0xcea   :  { %4123 = vmatpush3.bf16.msra.mxu0 %v4120_v6  ;;  %v4124_v1 = vpack.c.bf16 %v3637_v0, %v3636_v63  ;;  %v3642_v6 = vld [vmem:[%s4857_s6 + $0x48] sm:$0xff] }
 0xcec   :  { %4125 = vmatprep.subr.bf16.mxu1 %v4124_v1 }
 0xced   :  { %4127 = vmatpush3.bf16.msra.mxu1 %v4124_v1 }
 0xcee   :  { %4129 = vmatprep.subr.bf16.mxu1 %v4128_v4 }
 0xcf1   :  { %4131 = vmatpush3.bf16.msra.mxu1 %v4128_v4 }
 0xda0   :  { %v2091_v9 = vpop.f32.mrb[26].mxu1 }
 0xda1   :  { %v3956_v10 = vpop.f32.mrb[27].mxu1  ;;  %v2095_v15 = vmul.f32 %v4356_v16, %v2091_v9  ;;  %v3643_v9 = vld [vmem:[%s4857_s6 + $0x50] sm:$0xff] }
 0xda2   :  { %v4132_v10 = vpack.c.bf16 %v3642_v6, %v3641_v8 }
 0xda4   :  { %v2252_v11 = vpop.f32.mrb[28].mxu1  ;;  %4133 = vmatprep.subr.bf16.mxu0 %v4132_v10 }
 0xda5   :  { %v2256_v18 = vmul.f32 %v4359_v17, %v2252_v11  ;;  %v3966_v19 = vpop.f32.mrb[29].mxu1  ;;  %v3644_v11 = vld [vmem:[%s4857_s6 + $0x58] sm:$0xff] }
 0xda6   :  { %v3646_v19 = vld [vmem:[%s4857_s6 + $0x68] sm:$0xff] }
 0xda7   :  { %v2257_v20 = vadd.f32 %v2256_v18, %v2095_v15  ;;  %v4136_v15 = vpack.c.bf16 %v3644_v11, %v3643_v9  ;;  %v3645_v18 = vld [vmem:[%s4857_s6 + $0x60] sm:$0xff] }
 0xda8   :  { %v2413_v22 = vpop.f32.mrb[30].mxu1 }
 0xda9   :  { %v2417_v24 = vmul.f32 %v4370_v21, %v2413_v22  ;;  %v3976_v25 = vpop.f32.mrb[31].mxu1 }
 0xdab   :  { %v2418_v26 = vadd.f32 %v2417_v24, %v2257_v20  ;;  %v4140_v20 = vpack.c.bf16 %v3646_v19, %v3645_v18 }
 0xdac   :  { %v2574_v27 = vpop.f32.mrb[32].mxu1 }
 0xdad   :  { %v2578_v28 = vmul.f32 %v4383_v23, %v2574_v27  ;;  %v3986_v29 = vpop.f32.mrb[33].mxu1 }
 0xdaf   :  { %v2579_v30 = vadd.f32 %v2578_v28, %v2418_v26 }
 0xdb0   :  { %v2743_v31 = vpop.f32.mrb[34].mxu1 }
 0xdb1   :  { %v3996_v32 = vpop.f32.mrb[35].mxu1  ;;  %4035 = vmatprep.mubr.msk.f32.mxu0 %vm83_vm0, %v2579_v30  ;;  %v2747_v34 = vmul.f32 %v4356_v16, %v2743_v31  ;;  %v4764_v16 = vld [vmem:[%s4858_s7 + $0x8] sm:$0x3f] }
 0xdb2   :  { %v3346_v29 = vrot.slane %v4764_v16, %v1584_v38  ;;  %v3352_v32 = vrot.slane %v4764_v16, %v1590_v39  ;;  %v3647_v38 = vld [vmem:[%s4857_s6 + $0x70] sm:$0xff]  ;;  %v3648_v39 = vld [vmem:[%s4857_s6 + $0x78] sm:$0xff]  ;;  %v3560_v8 = vrot.slane %v4764_v16, %v1799_v36  ;;  %v3566_v11 = vrot.slane %v4764_v16, %v1805_v37 }
 0xdb4   :  { %v2904_v33 = vpop.f32.mrb[36].mxu1 }
 0xdb5   :  { %v2908_v35 = vmul.f32 %v4359_v17, %v2904_v33  ;;  %v4006_v40 = vpop.f32.mrb[37].mxu1  ;;  %v3235_v17 = vrot.slane %v4764_v16, %v1472_v55 }
 0xdb7   :  { %v2909_v41 = vadd.f32 %v2908_v35, %v2747_v34 }
 0xdb8   :  { %v3065_v42 = vpop.f32.mrb[38].mxu1 }
 0xdb9   :  { %v3069_v43 = vmul.f32 %v4370_v21, %v3065_v42  ;;  %v4016_v44 = vpop.f32.mrb[39].mxu1 }
 0xdbb   :  { %v3070_v45 = vadd.f32 %v3069_v43, %v2909_v41 }
 0xdbc   :  { %v3226_v46 = vpop.f32.mrb[40].mxu1 }
 0xdbd   :  { %v3230_v47 = vmul.f32 %v4383_v23, %v3226_v46  ;;  %v4026_v48 = vpop.f32.mrb[41].mxu1 }
 0xdbf   :  { %v3231_v50 = vadd.f32 %v3230_v47, %v3070_v45  ;;  %v4144_v45 = vpack.c.bf16 %v3648_v39, %v3647_v38 }
 0xdc1   :  { %4036 = vmatmul.mubr.msk.f32.vlgmr.msra.gmra.mrb[32].mxu0 %vm83_vm0, %v3231_v50 }
 0xdc2   :  { %4135 = vmatpush3.bf16.msra.mxu0 %v4132_v10 }
 0xdc3   :  { %4137 = vmatprep.subr.bf16.mxu0 %v4136_v15 }
 0xdc6   :  { %4139 = vmatpush3.bf16.msra.mxu0 %v4136_v15 }
 0xdc7   :  { %4141 = vmatprep.subr.bf16.mxu0 %v4140_v20 }
 0xdca   :  { %4143 = vmatpush3.bf16.msra.mxu0 %v4140_v20 }
 0xdcb   :  { %4145 = vmatprep.subr.bf16.mxu0 %v4144_v45 }
 0xdce   :  { %4147 = vmatpush3.bf16.msra.mxu0 %v4144_v45 }
 0xe94   :  { %v4037_v7 = vpop.f32.mrb[32].mxu0 }
 0xe95   :  { %v3314_v21 = vadd.f32 %v4037_v7, %v3235_v17  ;;  %v3308_v57 = vpop.f32.mrb[33].mxu0  ;;  %v3449_v7 = vrot.slane %v4764_v16, %v1687_v14 }
 0xe96   :  { %v3309_v56 = vadd.f32 %v3308_v57, %v3235_v17 }
 0xe97   :  { %v3320_v5 = vsel %vm83_vm0, %v3314_v21, 0.0 }
 0xe98   :  { %3321 = vadd.xlane.f32.xlu1 %v3320_v5  ;;  %v3317_v23 = vsel %vm83_vm0, %v3309_v56, 0.0 }
 0xe99   :  { %3318 = vadd.xlane.f32.xlu0 %v3317_v23 }
 0xf25   :  { %v3322_v49 = vpop.xlane.xlu1 %3321 }
 0xf26   :  { %v3324_v51 = vmul.f32 0.03125, %v3322_v49  ;;  %v3319_v58 = vpop.xlane.xlu0 %3318 }
 0xf27   :  { %v3323_v12 = vmul.f32 0.03125, %v3319_v58 }
 0xf28   :  { %v3326_v13 = vsub.f32 %v3314_v21, %v3324_v51 }
 0xf29   :  { %v3325_v59 = vsub.f32 %v3309_v56, %v3323_v12 }
 0xf2a   :  { %v3328_v55 = vmul.f32 %v3326_v13, %v3326_v13 }
 0xf2b   :  { %v3327_v60 = vmul.f32 %v3325_v59, %v3325_v59 }
 0xf2c   :  { %v3332_v62 = vsel %vm83_vm0, %v3328_v55, 0.0 }
 0xf2d   :  { %v3329_v61 = vsel %vm83_vm0, %v3327_v60, 0.0 }
 0xf2e   :  { %3330 = vadd.xlane.f32.xlu0 %v3329_v61 }
 0xf32   :  { %3333 = vadd.xlane.f32.xlu0 %v3332_v62 }
 0xfbb   :  { %v3331_v22 = vpop.xlane.xlu0 %3330 }
 0xfbc   :  { %v3335_v24 = vmul.f32 0.03125, %v3331_v22 }
 0xfbe   :  { %v3337_v25 = vadd.f32 1e-05, %v3335_v24 }
 0xfbf   :  { %v3334_v26 = vpop.xlane.xlu0 %3333 }
 0xfc0   :  { %4227 = vrsqrt.f32 %v3337_v25  ;;  %v3336_v27 = vmul.f32 0.03125, %v3334_v26 }
 0xfc2   :  { %v3338_v28 = vadd.f32 1e-05, %v3336_v27 }
 0xfc4   :  { %4229 = vrsqrt.f32 %v3338_v28 }
 0xfca   :  { %v4228_v30 = vpop.eup %4227 }
 0xfcb   :  { %v3341_v31 = vmul.f32 %v4228_v30, %v3325_v59 }
 0xfcd   :  { %v3347_v33 = vmul.f32 %v3346_v29, %v3341_v31 }
 0xfce   :  { %v4230_v34 = vpop.eup %4229 }
 0xfcf   :  { %v3342_v35 = vmul.f32 %v4230_v34, %v3326_v13  ;;  %v3353_v40 = vadd.f32 %v3352_v32, %v3347_v33 }
 0xfd1   :  { %v3348_v41 = vmul.f32 %v3346_v29, %v3342_v35  ;;  %v3355_v42 = vadd.f32 %v3353_v40, %v4607_v52  ;;  %v3679_v52 = vld [vmem:[%s4856_s5 + $0x1] ss:$0 sm:$0xff]  ;;  %s4263_s5 = smov [#allocation2]  }
 0xfd2   :  { %s3578_s6 = sshll.u32 %s4263_s5, 4  ;;  %s3579_s6 = int_to_ptr.vmem [resolvable:$true] %s3578_s6 }
 0xfd3   :  { %v3354_v43 = vadd.f32 %v3352_v32, %v3348_v41  ;;  %4046 = vmatprep.mubr.msk.f32.mxu1 %vm83_vm0, %v3355_v42  ;;  %s4235_s3 = scalar_lea.vmem %s3579_s6, 256  ;;  %p4240_p1 = scmp.lt.s32.totalorder %s3579_s6, %s3579_s6 }
 0xfd4   :  { %p4236_p0 = scmp.ne.s32.totalorder %s3579_s6, %s4235_s3  ;;  %p4241_p2 = scmp.lt.s32.totalorder %s4235_s3, %s4235_s3 }
 0xfd5   :  { %v3356_v44 = vadd.f32 %v3354_v43, %v4610_v53 }
 0xfd6   :  { %p4242_p3 = por %p4241_p2, %p4240_p1 }
 0xfd7   :  { %4047 = vmatmul.mubr.msk.f32.vlgmr.msra.gmra.mrb[42].mxu1 %vm83_vm0, %v3356_v44 }
 0xfd8   :  { %p4243_p4 = pnand %p4242_p3, %p4236_p0 }
0x10aa   :  { %v4048_v46 = vpop.f32.mrb[42].mxu1 }
0x10ab   :  { %v3441_v47 = vadd.f32 %v4048_v46, %v3679_v52  ;;  %v3435_v53 = vpop.f32.mrb[43].mxu1 }
0x10ac   :  { %v3436_v48 = vadd.f32 %v3679_v52, %v3435_v53 }
0x10ad   :  { %v3445_v17 = vmax.f32 %v3441_v47, 0.0 }
0x10ae   :  { %v3444_v50 = vmax.f32 %v3436_v48, 0.0 }
0x10b0   :  { %4065 = vmatprep.mubr.msk.f32.mxu0 %vm1689_vm13, %v3444_v50 }
0x10b1   :  { %4066 = vmatmul.mubr.msk.f32.vlgmr.msra.gmra.mrb[34].mxu0 %vm1689_vm13, %v3445_v17 }
0x1184   :  { %v4067_v21 = vpop.f32.mrb[34].mxu0 }
0x1185   :  { %v3528_v57 = vadd.f32 %v4067_v21, %v3449_v7  ;;  %v3522_v56 = vpop.f32.mrb[35].mxu0 }
0x1186   :  { %v3523_v5 = vadd.f32 %v3522_v56, %v3449_v7 }
0x1187   :  { %v3534_v23 = vsel %vm83_vm0, %v3528_v57, 0.0 }
0x1188   :  { %3535 = vadd.xlane.f32.xlu0 %v3534_v23  ;;  %v3531_v49 = vsel %vm83_vm0, %v3523_v5, 0.0 }
0x1189   :  { %3532 = vadd.xlane.f32.xlu1 %v3531_v49 }
0x1215   :  { %v3536_v51 = vpop.xlane.xlu0 %3535 }
0x1216   :  { %v3538_v58 = vmul.f32 0.03125, %v3536_v51  ;;  %v3533_v12 = vpop.xlane.xlu1 %3532 }
0x1217   :  { %v3537_v13 = vmul.f32 0.03125, %v3533_v12 }
0x1218   :  { %v3540_v59 = vsub.f32 %v3528_v57, %v3538_v58 }
0x1219   :  { %v3539_v60 = vsub.f32 %v3523_v5, %v3537_v13 }
0x121a   :  { %v3542_v61 = vmul.f32 %v3540_v59, %v3540_v59 }
0x121b   :  { %v3541_v55 = vmul.f32 %v3539_v60, %v3539_v60 }
0x121c   :  { %v3546_v14 = vsel %vm83_vm0, %v3542_v61, 0.0 }
0x121d   :  { %3547 = vadd.xlane.f32.xlu0 %v3546_v14  ;;  %v3543_v62 = vsel %vm83_vm0, %v3541_v55, 0.0 }
0x121e   :  { %3544 = vadd.xlane.f32.xlu1 %v3543_v62 }
0x12aa   :  { %v3548_v63 = vpop.xlane.xlu0 %3547 }
0x12ab   :  { %v3550_v0 = vmul.f32 0.03125, %v3548_v63  ;;  %v3545_v1 = vpop.xlane.xlu1 %3544 }
0x12ac   :  { %v3549_v2 = vmul.f32 0.03125, %v3545_v1 }
0x12ad   :  { %v3552_v3 = vadd.f32 1e-05, %v3550_v0 }
0x12ae   :  { %v3551_v4 = vadd.f32 1e-05, %v3549_v2 }
0x12af   :  { %4231 = vrsqrt.f32 %v3552_v3 }
0x12b0   :  { %4233 = vrsqrt.f32 %v3551_v4 }
0x12b9   :  { %v4232_v6 = vpop.eup %4231 }
0x12ba   :  { %v4234_v9 = vpop.eup %4233  ;;  %v3556_v10 = vmul.f32 %v4232_v6, %v3540_v59 }
0x12bb   :  { %v3555_v15 = vmul.f32 %v4234_v9, %v3539_v60 }
0x12bc   :  { %v3562_v18 = vmul.f32 %v3560_v8, %v3556_v10 }
0x12bd   :  { %v3561_v19 = vmul.f32 %v3560_v8, %v3555_v15 }
0x12be   :  { %v3568_v20 = vadd.f32 %v3566_v11, %v3562_v18 }
0x12bf   :  { %v3567_v22 = vadd.f32 %v3566_v11, %v3561_v19 }
0x12c0   :  { %v3570_v24 = vadd.f32 %v3568_v20, %v3356_v44 }
0x12c1   :  { %v3569_v25 = vadd.f32 %v3567_v22, %v3355_v42 }
0x12c2   :  { %3572 = vst.msk [vmem:[#allocation2 + $0x8] sm:$0xff] %vm83_vm0, %v3570_v24 }
0x12c3   :  { %3571 = vst.msk [vmem:[#allocation2] sm:$0xff] %vm83_vm0, %v3569_v25 }
0x12c4   :  { %4246 = shalt.err (!%p4243_p4)
}
0x12c5   :  { %s4247_s29 = scalar_lea.hbm %s4859_s8, 256 }
0x12c6   :  { %p4248_p5 = scmp.ne.s32.totalorder %s4859_s8, %s4247_s29  ;;  %p4251_p6 = scmp.lt.u32.totalorder %s4247_s29, %s4859_s8 }
0x12c8   :  { %p4253_p7 = pnand %p4251_p6, %p4248_p5 }
0x12ca   :  { %4256 = shalt.err (!%p4253_p7)
}
0x12cb   :  { %s4264_s12 = smov 128   ;;  %s4265_s13 = smov 8  }
0x12cc   :  { %3584 = dma.vmem_to_hbm [thread:$0]  %s3579_s6, 256, %s4859_s8, [#allocation3], %s4264_s12, %s4264_s12, %s4265_s13  }
0x12cd   :  { %4257 = dma.done.wait [#allocation3], 256  }
0x12ce   :  { %4258 = vsyncadd [#allocation3], 4294967040 }
0x12cf   :  { %3588 = vsyncpa [#allocation3], 1 }

</bundles_post_ra>
